<compile_context>
chip_gen: v5e
topology: v5e:2x2
jax: 0.10.0
libtpu: 0.0.40
codegen_flags: <defaults>
</compile_context>

<pallas_src>
import math
import functools

import jax
import jax.numpy as jnp
from jax import lax
from jax.experimental import pallas as pl
from jax.experimental.pallas import tpu as pltpu


NUM_CLASSES = 15
NUM_CLASSES_PAD = 128          # lane-dense classifier output, sliced in wrapper


def _const_spec(shape):
    """BlockSpec covering the whole array (constant block index, any grid)."""
    nd = len(shape)
    return pl.BlockSpec(shape, lambda *_: (0,) * nd)


def _layer_spec(arr):
    """BlockSpec selecting one layer's slice of a layer-stacked parameter."""
    nd = arr.ndim
    return pl.BlockSpec((1,) + arr.shape[1:],
                        lambda l, nd=nd: (l,) + (0,) * (nd - 1))


# ----------------------------- Pallas kernels ------------------------------

def patch_embed_kernel(p_ref, w_ref, b_ref, out_ref):
    # patches (M, C*P*P) bf16 @ w (C*P*P, D) bf16 -> f32 accumulate, + f32 bias.
    out_ref[...] = (jnp.dot(p_ref[...], w_ref[...],
                            preferred_element_type=jnp.float32) + b_ref[...])


def encoder_stack_kernel(x_ref,
                         wq_ref, bq_ref, wk_ref, bk_ref, wv_ref, bv_ref,
                         wo_ref, bo_ref, g1_ref, be1_ref,
                         w1_ref, b1_ref, w2_ref, b2_ref, g2_ref, be2_ref,
                         cw1_ref, cb1_ref, cw2_ref, cb2_ref, cw3_ref, cb3_ref,
                         out_ref, act_ref, *, nhead, batch, seq_real):
    """grid=(num_layers,): one grid step per encoder layer.  The activation
    stays resident in VMEM (act_ref) across layers; the classifier MLP runs
    fused on the last step so only (B, NUM_CLASSES_PAD) logits reach HBM."""
    l = pl.program_id(0)
    nlayers = pl.num_programs(0)

    @pl.when(l == 0)
    def _init():
        act_ref[...] = x_ref[...]

    x = act_ref[...]                       # (M, D) f32, M = B * Sp
    M, D = x.shape
    Sp = M // batch
    hd = D // nhead
    bf16 = jnp.bfloat16

    def linear(a, w, b):                   # bf16 MXU operands, f32 accumulate
        return jnp.dot(a.astype(bf16), w,
                       preferred_element_type=jnp.float32) + b

    def layernorm(a, g_ref, b_ref):        # fused one-pass mean / E[x^2]
        mu = jnp.mean(a, axis=-1, keepdims=True)
        var = jnp.mean(a * a, axis=-1, keepdims=True) - mu * mu
        return (a - mu) * lax.rsqrt(var + 1e-5) * g_ref[0] + b_ref[0]

    # --- multi-head self attention (post-norm, nn.TransformerEncoderLayer) ---
    # Per-(batch, head) attention: heads use per-head weight slabs (free Ref
    # indexing, no lane-dim slicing / concat) and B is a leading batch dim of
    # the score / context matmuls, so no (B*S, B*S) bias matrix is needed.
    x_bf = x.astype(bf16)
    if seq_real < Sp:                      # mask padded key columns only
        kmask = jnp.where(
            lax.broadcasted_iota(jnp.int32, (1, 1, Sp), 2) < seq_real,
            0.0, -1e30).astype(jnp.float32)
    else:
        kmask = None

    attn = jnp.zeros((M, D), jnp.float32)
    for h in range(nhead):                 # static unroll, nhead is small
        # 1/sqrt(hd) is folded into wq/bq by the wrapper.
        qh = (jnp.dot(x_bf, wq_ref[0, h], preferred_element_type=jnp.float32)
              + bq_ref[0, h]).reshape(batch, Sp, hd)
        kh = (jnp.dot(x_bf, wk_ref[0, h], preferred_element_type=jnp.float32)
              + bk_ref[0, h]).reshape(batch, Sp, hd)
        vh = (jnp.dot(x_bf, wv_ref[0, h], preferred_element_type=jnp.float32)
              + bv_ref[0, h]).reshape(batch, Sp, hd)

        s = jnp.einsum('bqd,bkd->bqk', qh.astype(bf16), kh.astype(bf16),
                       preferred_element_type=jnp.float32)
        if kmask is not None:
            s = s + kmask
        s = s - jnp.max(s, axis=-1, keepdims=True)
        e = jnp.exp(s)
        p = e * pl.reciprocal(jnp.sum(e, axis=-1, keepdims=True), approx=True)

        ctx = jnp.einsum('bqk,bkd->bqd', p.astype(bf16), vh.astype(bf16),
                         preferred_element_type=jnp.float32)
        attn = attn + jnp.dot(ctx.reshape(M, hd).astype(bf16), wo_ref[0, h],
                              preferred_element_type=jnp.float32)
    attn = attn + bo_ref[0]

    x1 = layernorm(x + attn, g1_ref, be1_ref)

    # --- feed-forward (ReLU; dropout = identity in eval mode) ---
    # TODO(synk): tile the M (row) dim with fori_loop over pl.ds chunks once
    #             M*FF no longer fits comfortably in VMEM (real ViT shapes).
    h1 = jnp.maximum(linear(x1, w1_ref[0], b1_ref[0]), 0.0)
    x2 = layernorm(x1 + linear(h1, w2_ref[0], b2_ref[0]), g2_ref, be2_ref)

    act_ref[...] = x2

    # --- last layer: fused classifier head on the cls rows only ---
    @pl.when(l == nlayers - 1)
    def _head():
        cls = x2.reshape(batch, Sp, D)[:, 0, :]            # (B, D)
        h1c = jnp.maximum(linear(cls, cw1_ref[...], cb1_ref[...]), 0.0)
        h2c = jnp.maximum(linear(h1c, cw2_ref[...], cb2_ref[...]), 0.0)
        out_ref[...] = linear(h2c, cw3_ref[...], cb3_ref[...])


# ------------------------------ wrappers -----------------------------------

def positional_encoding(seq_len, d_model):
    position = jnp.arange(seq_len, dtype=jnp.float32)[:, None]
    div_term = jnp.exp(jnp.arange(0, d_model, 2, dtype=jnp.float32)
                       * (-math.log(10000.0) / d_model))
    pe = jnp.zeros((seq_len, d_model), jnp.float32)
    pe = pe.at[:, 0::2].set(jnp.sin(position * div_term))
    pe = pe.at[:, 1::2].set(jnp.cos(position * div_term))
    return pe


def vit_forward(x, params, patch_size, nhead):
    B, C, H, W = x.shape
    P = patch_size
    Hp, Wp = H // P, W // P
    D = params["patch_w"].shape[1]

    # --- patch embedding: Conv2d(k=stride=P) == matmul over flattened patches ---
    patches = (x.reshape(B, C, Hp, P, Wp, P)
                 .transpose(0, 2, 4, 1, 3, 5)
                 .reshape(B * Hp * Wp, C * P * P)).astype(jnp.bfloat16)
    emb = pl.pallas_call(
        patch_embed_kernel,
        out_shape=jax.ShapeDtypeStruct((B * Hp * Wp, D), jnp.float32),
        in_specs=[_const_spec(patches.shape),
                  _const_spec(params["patch_w"].shape),
                  _const_spec(params["patch_b"].shape)],
        out_specs=_const_spec((B * Hp * Wp, D)),
    )(patches, params["patch_w"], params["patch_b"])
    # TODO(synk): tile patch-embed over rows when B*Hp*Wp grows large.
    emb = emb.reshape(B, Hp * Wp, D)

    # --- cls token + positional encoding (layout glue) ---
    cls = jnp.broadcast_to(params["cls"], (B, 1, D))
    seq = jnp.concatenate([cls, emb], axis=1)
    S = seq.shape[1]
    seq = seq + positional_encoding(S, D)[None]

    # sublane-align the token axis; padded key columns are masked in-kernel.
    Sp = (S + 7) // 8 * 8
    if Sp != S:
        seq = jnp.pad(seq, ((0, 0), (0, Sp - S), (0, 0)))
    M = B * Sp
    seq2d = seq.reshape(M, D).astype(jnp.float32)

    # fold the 1/sqrt(head_dim) softmax scale into the query projection
    hd = D // nhead
    scale = 1.0 / math.sqrt(hd)
    wq = params["wq"] * scale              # bf16 * python float stays bf16
    bq = params["bq"] * scale

    L = params["wq"].shape[0]
    FF = params["w1"].shape[2]
    layer_weights = [wq, bq, params["wk"], params["bk"],
                     params["wv"], params["bv"], params["wo"], params["bo"],
                     params["ln1_g"], params["ln1_b"],
                     params["w1"], params["b1"], params["w2"], params["b2"],
                     params["ln2_g"], params["ln2_b"]]
    head_weights = [params["cw1"], params["cb1"], params["cw2"],
                    params["cb2"], params["cw3"], params["cb3"]]

    in_specs = ([_const_spec((M, D))]
                + [_layer_spec(w) for w in layer_weights]
                + [_const_spec(w.shape) for w in head_weights])

    flops_layer = 8 * M * D * D + 4 * M * Sp * D + 4 * M * D * FF
    flops_head = 2 * B * (D * 512 + 512 * 256 + 256 * NUM_CLASSES_PAD)
    cost = pl.CostEstimate(
        flops=L * flops_layer + flops_head,
        transcendentals=L * (B * nhead * Sp * Sp + 4 * M),
        bytes_accessed=(4 * M * D + 4 * B * NUM_CLASSES_PAD
                        + 2 * L * (4 * D * D + 2 * D * FF)
                        + 4 * L * (8 * D + 2 * FF)
                        + 2 * (D * 512 + 512 * 256 + 256 * NUM_CLASSES_PAD)),
    )

    logits_pad = pl.pallas_call(
        functools.partial(encoder_stack_kernel,
                          nhead=nhead, batch=B, seq_real=S),
        out_shape=jax.ShapeDtypeStruct((B, NUM_CLASSES_PAD), jnp.float32),
        grid=(L,),
        in_specs=in_specs,
        out_specs=_const_spec((B, NUM_CLASSES_PAD)),
        scratch_shapes=[pltpu.VMEM((M, D), jnp.float32)],
        compiler_params=pltpu.CompilerParams(
            dimension_semantics=("arbitrary",),
            vmem_limit_bytes=64 * 1024 * 1024),
        cost_estimate=cost,
    )(seq2d, *layer_weights, *head_weights)

    return logits_pad[:, :NUM_CLASSES]


# ------------------------- deterministic parameters -------------------------

def init_params(key, C, P, D, nhead, nlayers, ff):
    keys = iter(jax.random.split(key, 64))
    hd = D // nhead

    def nrm(shape, scale=0.02, dtype=jnp.bfloat16):
        return (scale * jax.random.normal(next(keys), shape, jnp.float32)
                ).astype(dtype)

    z = lambda s: jnp.zeros(s, jnp.float32)
    o = lambda s: jnp.ones(s, jnp.float32)

    w3 = nrm((256, NUM_CLASSES), dtype=jnp.float32)
    params = {
        # Conv2d weight (D, C, P, P) flattened over (C, ph, pw), pre-transposed.
        "patch_w": nrm((C * P * P, D)),
        "patch_b": z((1, D)),
        "cls": nrm((1, 1, D), 1.0, jnp.float32),
        # classifier head: bf16 weights (D_in, D_out), f32 biases; last layer
        # lane-padded to NUM_CLASSES_PAD for a dense store.
        "cw1": nrm((D, 512)), "cb1": z((1, 512)),
        "cw2": nrm((512, 256)), "cb2": z((1, 256)),
        "cw3": jnp.pad(w3, ((0, 0), (0, NUM_CLASSES_PAD - NUM_CLASSES))
                       ).astype(jnp.bfloat16),
        "cb3": z((1, NUM_CLASSES_PAD)),
        # encoder stack: leading layer axis; attention weights stored as
        # per-head bf16 slabs (L, H, D, hd) / (L, H, hd, D); biases & LN f32.
        "wq": nrm((nlayers, nhead, D, hd)), "bq": z((nlayers, nhead, 1, hd)),
        "wk": nrm((nlayers, nhead, D, hd)), "bk": z((nlayers, nhead, 1, hd)),
        "wv": nrm((nlayers, nhead, D, hd)), "bv": z((nlayers, nhead, 1, hd)),
        "wo": nrm((nlayers, nhead, hd, D)), "bo": z((nlayers, 1, D)),
        "ln1_g": o((nlayers, 1, D)), "ln1_b": z((nlayers, 1, D)),
        "w1": nrm((nlayers, D, ff)), "b1": z((nlayers, 1, ff)),
        "w2": nrm((nlayers, ff, D)), "b2": z((nlayers, 1, D)),
        "ln2_g": o((nlayers, 1, D)), "ln2_b": z((nlayers, 1, D)),
    }
    return params


if __name__ == "__main__":
    # Small, module-consistent shapes: num_patches = 4, seq len = 5 (padded to 8).
    B, C, IMG, P = 2, 4, 16, 8
    D, NHEAD, NLAYERS, FF = 32, 4, 2, 64

    key = jax.random.PRNGKey(0)
    k_x, k_p = jax.random.split(key)
    x = jax.random.normal(k_x, (B, C, IMG, IMG), jnp.float32)   # NCHW
    params = init_params(k_p, C, P, D, NHEAD, NLAYERS, FF)

    fwd = jax.jit(functools.partial(vit_forward, patch_size=P, nhead=NHEAD))
    logits = fwd(x, params)
    jax.block_until_ready(logits)
    assert logits.shape == (B, NUM_CLASSES) and logits.dtype == jnp.float32
    print("KERNEL_OK")
</pallas_src>

<mosaic_0001>
module attributes {stable_mosaic.version = 11 : i64} {
  func.func @patch_embed_kernel(%arg0: memref<8x256xbf16, #tpu.memory_space<vmem>>, %arg1: memref<256x32xbf16, #tpu.memory_space<vmem>>, %arg2: memref<1x32xf32, #tpu.memory_space<vmem>>, %arg3: memref<8x32xf32, #tpu.memory_space<vmem>>) attributes {dimension_semantics = [], scalar_prefetch = 0 : i64, scratch_operands = 0 : i64, tpu.core_type = #tpu.core_type<tc>} {
    %c0 = arith.constant 0 : index
    %c0_0 = arith.constant 0 : index
    %0 = vector.load %arg0[%c0, %c0_0] : memref<8x256xbf16, #tpu.memory_space<vmem>>, vector<8x256xbf16>
    %c0_1 = arith.constant 0 : index
    %c0_2 = arith.constant 0 : index
    %1 = vector.load %arg1[%c0_1, %c0_2] : memref<256x32xbf16, #tpu.memory_space<vmem>>, vector<256x32xbf16>
    %cst = arith.constant dense<0.000000e+00> : vector<8x32xf32>
    %2 = tpu.matmul %0, %1, %cst {dimension_numbers = #tpu.dot_dimension_numbers<[1], [0], [0], [1], [0, 0, 1, 1], [], []>} : vector<8x256xbf16>, vector<256x32xbf16>, vector<8x32xf32> -> vector<8x32xf32>
    %c0_3 = arith.constant 0 : index
    %c0_4 = arith.constant 0 : index
    %3 = vector.load %arg2[%c0_3, %c0_4] : memref<1x32xf32, #tpu.memory_space<vmem>>, vector<1x32xf32>
    %4 = vector.broadcast %3 : vector<1x32xf32> to vector<8x32xf32>
    %5 = arith.addf %2, %4 : vector<8x32xf32>
    %c0_5 = arith.constant 0 : index
    %c0_6 = arith.constant 0 : index
    %6 = vector.load %arg3[%c0_5, %c0_6] : memref<8x32xf32, #tpu.memory_space<vmem>>, vector<8x32xf32>
    tpu.vector_store %arg3[%c0_5, %c0_6], %5 {strides = array<i32>} : memref<8x32xf32, #tpu.memory_space<vmem>>, vector<8x32xf32>,
    return
  }
}

module attributes {stable_mosaic.version = 11 : i64} {
  func.func @encoder_stack_kernel(%arg0: i32, %arg1: memref<16x32xf32, #tpu.memory_space<vmem>>, %arg2: memref<1x4x32x8xbf16, #tpu.memory_space<vmem>>, %arg3: memref<1x4x1x8xf32, #tpu.memory_space<vmem>>, %arg4: memref<1x4x32x8xbf16, #tpu.memory_space<vmem>>, %arg5: memref<1x4x1x8xf32, #tpu.memory_space<vmem>>, %arg6: memref<1x4x32x8xbf16, #tpu.memory_space<vmem>>, %arg7: memref<1x4x1x8xf32, #tpu.memory_space<vmem>>, %arg8: memref<1x4x8x32xbf16, #tpu.memory_space<vmem>>, %arg9: memref<1x1x32xf32, #tpu.memory_space<vmem>>, %arg10: memref<1x1x32xf32, #tpu.memory_space<vmem>>, %arg11: memref<1x1x32xf32, #tpu.memory_space<vmem>>, %arg12: memref<1x32x64xbf16, #tpu.memory_space<vmem>>, %arg13: memref<1x1x64xf32, #tpu.memory_space<vmem>>, %arg14: memref<1x64x32xbf16, #tpu.memory_space<vmem>>, %arg15: memref<1x1x32xf32, #tpu.memory_space<vmem>>, %arg16: memref<1x1x32xf32, #tpu.memory_space<vmem>>, %arg17: memref<1x1x32xf32, #tpu.memory_space<vmem>>, %arg18: memref<32x512xbf16, #tpu.memory_space<vmem>>, %arg19: memref<1x512xf32, #tpu.memory_space<vmem>>, %arg20: memref<512x256xbf16, #tpu.memory_space<vmem>>, %arg21: memref<1x256xf32, #tpu.memory_space<vmem>>, %arg22: memref<256x128xbf16, #tpu.memory_space<vmem>>, %arg23: memref<1x128xf32, #tpu.memory_space<vmem>>, %arg24: memref<2x128xf32, #tpu.memory_space<vmem>>, %arg25: memref<16x32xf32, #tpu.memory_space<vmem>>) attributes {dimension_semantics = [#tpu.dimension_semantics<arbitrary>], iteration_bounds = array<i64: 2>, scalar_prefetch = 0 : i64, scratch_operands = 1 : i64, tpu.core_type = #tpu.core_type<tc>, window_params = [{pipeline_mode = #tpu.pipeline_mode<synchronous>, transform_indices = @transform_0, window_bounds = array<i64: 16, 32>}, {transform_indices = @transform_1, window_bounds = array<i64: 1, 4, 32, 8>}, {transform_indices = @transform_2, window_bounds = array<i64: 1, 4, 1, 8>}, {transform_indices = @transform_3, window_bounds = array<i64: 1, 4, 32, 8>}, {transform_indices = @transform_4, window_bounds = array<i64: 1, 4, 1, 8>}, {transform_indices = @transform_5, window_bounds = array<i64: 1, 4, 32, 8>}, {transform_indices = @transform_6, window_bounds = array<i64: 1, 4, 1, 8>}, {transform_indices = @transform_7, window_bounds = array<i64: 1, 4, 8, 32>}, {transform_indices = @transform_8, window_bounds = array<i64: 1, 1, 32>}, {transform_indices = @transform_9, window_bounds = array<i64: 1, 1, 32>}, {transform_indices = @transform_10, window_bounds = array<i64: 1, 1, 32>}, {transform_indices = @transform_11, window_bounds = array<i64: 1, 32, 64>}, {transform_indices = @transform_12, window_bounds = array<i64: 1, 1, 64>}, {transform_indices = @transform_13, window_bounds = array<i64: 1, 64, 32>}, {transform_indices = @transform_14, window_bounds = array<i64: 1, 1, 32>}, {transform_indices = @transform_15, window_bounds = array<i64: 1, 1, 32>}, {transform_indices = @transform_16, window_bounds = array<i64: 1, 1, 32>}, {pipeline_mode = #tpu.pipeline_mode<synchronous>, transform_indices = @transform_17, window_bounds = array<i64: 32, 512>}, {pipeline_mode = #tpu.pipeline_mode<synchronous>, transform_indices = @transform_18, window_bounds = array<i64: 1, 512>}, {pipeline_mode = #tpu.pipeline_mode<synchronous>, transform_indices = @transform_19, window_bounds = array<i64: 512, 256>}, {pipeline_mode = #tpu.pipeline_mode<synchronous>, transform_indices = @transform_20, window_bounds = array<i64: 1, 256>}, {pipeline_mode = #tpu.pipeline_mode<synchronous>, transform_indices = @transform_21, window_bounds = array<i64: 256, 128>}, {pipeline_mode = #tpu.pipeline_mode<synchronous>, transform_indices = @transform_22, window_bounds = array<i64: 1, 128>}, {pipeline_mode = #tpu.pipeline_mode<synchronous>, transform_indices = @transform_23, window_bounds = array<i64: 2, 128>}]} {
    %c0_i32 = arith.constant 0 : i32
    %0 = arith.cmpi eq, %arg0, %c0_i32 : i32
    %1 = arith.extui %0 : i1 to i32
    %c0_i32_0 = arith.constant 0 : i32
    %2 = arith.cmpi ne, %1, %c0_i32_0 : i32
    scf.if %2 {
      %c0_188 = arith.constant 0 : index
      %c0_189 = arith.constant 0 : index
      %284 = vector.load %arg1[%c0_188, %c0_189] : memref<16x32xf32, #tpu.memory_space<vmem>>, vector<16x32xf32>
      %c0_190 = arith.constant 0 : index
      %c0_191 = arith.constant 0 : index
      %285 = vector.load %arg25[%c0_190, %c0_191] : memref<16x32xf32, #tpu.memory_space<vmem>>, vector<16x32xf32>
      tpu.vector_store %arg25[%c0_190, %c0_191], %284 {strides = array<i32>} : memref<16x32xf32, #tpu.memory_space<vmem>>, vector<16x32xf32>,
    } else {
    }
    %c0 = arith.constant 0 : index
    %c0_1 = arith.constant 0 : index
    %3 = vector.load %arg25[%c0, %c0_1] : memref<16x32xf32, #tpu.memory_space<vmem>>, vector<16x32xf32>
    %4 = arith.truncf %3 : vector<16x32xf32> to vector<16x32xbf16>
    %5 = tpu.iota {dimensions = array<i32: 2>} : vector<1x1x8xi32>
    %c5_i32 = arith.constant 5 : i32
    %6 = vector.broadcast %c5_i32 : i32 to vector<1x1x8xi32>
    %7 = arith.cmpi slt, %5, %6 : vector<1x1x8xi32>
    %cst = arith.constant 0.000000e+00 : f32
    %cst_2 = arith.constant -1.000000e+30 : f32
    %8 = vector.broadcast %cst : f32 to vector<1x1x8xf32>
    %9 = vector.broadcast %cst_2 : f32 to vector<1x1x8xf32>
    %10 = arith.select %7, %8, %9 : vector<1x1x8xi1>, vector<1x1x8xf32>
    %cst_3 = arith.constant 0.000000e+00 : f32
    %11 = vector.broadcast %cst_3 : f32 to vector<16x32xf32>
    %c0_4 = arith.constant 0 : index
    %c0_5 = arith.constant 0 : index
    %c0_6 = arith.constant 0 : index
    %c0_7 = arith.constant 0 : index
    %12 = vector.load %arg2[%c0_4, %c0_5, %c0_6, %c0_7] : memref<1x4x32x8xbf16, #tpu.memory_space<vmem>>, vector<1x1x32x8xbf16>
    %13 = vector.shape_cast %12 : vector<1x1x32x8xbf16> to vector<32x8xbf16>
    %cst_8 = arith.constant dense<0.000000e+00> : vector<16x8xf32>
    %14 = tpu.matmul %4, %13, %cst_8 {dimension_numbers = #tpu.dot_dimension_numbers<[1], [0], [0], [1], [0, 0, 1, 1], [], []>} : vector<16x32xbf16>, vector<32x8xbf16>, vector<16x8xf32> -> vector<16x8xf32>
    %c0_9 = arith.constant 0 : index
    %c0_10 = arith.constant 0 : index
    %c0_11 = arith.constant 0 : index
    %c0_12 = arith.constant 0 : index
    %15 = vector.load %arg3[%c0_9, %c0_10, %c0_11, %c0_12] : memref<1x4x1x8xf32, #tpu.memory_space<vmem>>, vector<1x1x1x8xf32>
    %16 = vector.shape_cast %15 : vector<1x1x1x8xf32> to vector<1x8xf32>
    %17 = vector.broadcast %16 : vector<1x8xf32> to vector<16x8xf32>
    %18 = arith.addf %14, %17 : vector<16x8xf32>
    %19 = vector.shape_cast %18 : vector<16x8xf32> to vector<2x8x8xf32>
    %c0_13 = arith.constant 0 : index
    %c0_14 = arith.constant 0 : index
    %c0_15 = arith.constant 0 : index
    %c0_16 = arith.constant 0 : index
    %20 = vector.load %arg4[%c0_13, %c0_14, %c0_15, %c0_16] : memref<1x4x32x8xbf16, #tpu.memory_space<vmem>>, vector<1x1x32x8xbf16>
    %21 = vector.shape_cast %20 : vector<1x1x32x8xbf16> to vector<32x8xbf16>
    %cst_17 = arith.constant dense<0.000000e+00> : vector<16x8xf32>
    %22 = tpu.matmul %4, %21, %cst_17 {dimension_numbers = #tpu.dot_dimension_numbers<[1], [0], [0], [1], [0, 0, 1, 1], [], []>} : vector<16x32xbf16>, vector<32x8xbf16>, vector<16x8xf32> -> vector<16x8xf32>
    %c0_18 = arith.constant 0 : index
    %c0_19 = arith.constant 0 : index
    %c0_20 = arith.constant 0 : index
    %c0_21 = arith.constant 0 : index
    %23 = vector.load %arg5[%c0_18, %c0_19, %c0_20, %c0_21] : memref<1x4x1x8xf32, #tpu.memory_space<vmem>>, vector<1x1x1x8xf32>
    %24 = vector.shape_cast %23 : vector<1x1x1x8xf32> to vector<1x8xf32>
    %25 = vector.broadcast %24 : vector<1x8xf32> to vector<16x8xf32>
    %26 = arith.addf %22, %25 : vector<16x8xf32>
    %27 = vector.shape_cast %26 : vector<16x8xf32> to vector<2x8x8xf32>
    %c0_22 = arith.constant 0 : index
    %c0_23 = arith.constant 0 : index
    %c0_24 = arith.constant 0 : index
    %c0_25 = arith.constant 0 : index
    %28 = vector.load %arg6[%c0_22, %c0_23, %c0_24, %c0_25] : memref<1x4x32x8xbf16, #tpu.memory_space<vmem>>, vector<1x1x32x8xbf16>
    %29 = vector.shape_cast %28 : vector<1x1x32x8xbf16> to vector<32x8xbf16>
    %cst_26 = arith.constant dense<0.000000e+00> : vector<16x8xf32>
    %30 = tpu.matmul %4, %29, %cst_26 {dimension_numbers = #tpu.dot_dimension_numbers<[1], [0], [0], [1], [0, 0, 1, 1], [], []>} : vector<16x32xbf16>, vector<32x8xbf16>, vector<16x8xf32> -> vector<16x8xf32>
    %c0_27 = arith.constant 0 : index
    %c0_28 = arith.constant 0 : index
    %c0_29 = arith.constant 0 : index
    %c0_30 = arith.constant 0 : index
    %31 = vector.load %arg7[%c0_27, %c0_28, %c0_29, %c0_30] : memref<1x4x1x8xf32, #tpu.memory_space<vmem>>, vector<1x1x1x8xf32>
    %32 = vector.shape_cast %31 : vector<1x1x1x8xf32> to vector<1x8xf32>
    %33 = vector.broadcast %32 : vector<1x8xf32> to vector<16x8xf32>
    %34 = arith.addf %30, %33 : vector<16x8xf32>
    %35 = vector.shape_cast %34 : vector<16x8xf32> to vector<2x8x8xf32>
    %36 = arith.truncf %19 : vector<2x8x8xf32> to vector<2x8x8xbf16>
    %37 = arith.truncf %27 : vector<2x8x8xf32> to vector<2x8x8xbf16>
    "tpu.trace_start"() <{level = 10 : i32, message = "bqd,bkd->bqk"}> : () -> ()
    %cst_31 = arith.constant dense<0.000000e+00> : vector<2x8x8xf32>
    %38 = tpu.matmul %36, %37, %cst_31 {dimension_numbers = #tpu.dot_dimension_numbers<[2], [2], [1], [1], [0, 0, 0, 1, 1, 1], [0], [0]>} : vector<2x8x8xbf16>, vector<2x8x8xbf16>, vector<2x8x8xf32> -> vector<2x8x8xf32>
    "tpu.trace_stop"() : () -> ()
    %39 = vector.broadcast %10 : vector<1x1x8xf32> to vector<2x8x8xf32>
    %40 = arith.addf %38, %39 : vector<2x8x8xf32>
    %cst_32 = arith.constant dense<0xFF800000> : vector<2x8xf32>
    %41 = vector.multi_reduction <maximumf>, %40, %cst_32 [2] : vector<2x8x8xf32> to vector<2x8xf32>
    %42 = vector.shape_cast %41 : vector<2x8xf32> to vector<2x8x1xf32>
    %43 = vector.broadcast %42 : vector<2x8x1xf32> to vector<2x8x8xf32>
    %44 = arith.subf %40, %43 : vector<2x8x8xf32>
    %45 = math.exp %44 : vector<2x8x8xf32>
    %cst_33 = arith.constant dense<0.000000e+00> : vector<2x8xf32>
    %46 = vector.multi_reduction <add>, %45, %cst_33 [2] : vector<2x8x8xf32> to vector<2x8xf32>
    %47 = vector.shape_cast %46 : vector<2x8xf32> to vector<2x8x1xf32>
    %48 = tpu.reciprocal %47 {approx = true} : vector<2x8x1xf32> -> vector<2x8x1xf32>
    %49 = vector.broadcast %48 : vector<2x8x1xf32> to vector<2x8x8xf32>
    %50 = arith.mulf %45, %49 : vector<2x8x8xf32>
    %51 = arith.truncf %50 : vector<2x8x8xf32> to vector<2x8x8xbf16>
    %52 = arith.truncf %35 : vector<2x8x8xf32> to vector<2x8x8xbf16>
    "tpu.trace_start"() <{level = 10 : i32, message = "bqk,bkd->bqd"}> : () -> ()
    %cst_34 = arith.constant dense<0.000000e+00> : vector<2x8x8xf32>
    %53 = tpu.matmul %51, %52, %cst_34 {dimension_numbers = #tpu.dot_dimension_numbers<[2], [1], [1], [2], [0, 0, 0, 1, 1, 2], [0], [0]>} : vector<2x8x8xbf16>, vector<2x8x8xbf16>, vector<2x8x8xf32> -> vector<2x8x8xf32>
    "tpu.trace_stop"() : () -> ()
    %54 = vector.shape_cast %53 : vector<2x8x8xf32> to vector<16x8xf32>
    %55 = arith.truncf %54 : vector<16x8xf32> to vector<16x8xbf16>
    %c0_35 = arith.constant 0 : index
    %c0_36 = arith.constant 0 : index
    %c0_37 = arith.constant 0 : index
    %c0_38 = arith.constant 0 : index
    %56 = vector.load %arg8[%c0_35, %c0_36, %c0_37, %c0_38] : memref<1x4x8x32xbf16, #tpu.memory_space<vmem>>, vector<1x1x8x32xbf16>
    %57 = vector.shape_cast %56 : vector<1x1x8x32xbf16> to vector<8x32xbf16>
    %cst_39 = arith.constant dense<0.000000e+00> : vector<16x32xf32>
    %58 = tpu.matmul %55, %57, %cst_39 {dimension_numbers = #tpu.dot_dimension_numbers<[1], [0], [0], [1], [0, 0, 1, 1], [], []>} : vector<16x8xbf16>, vector<8x32xbf16>, vector<16x32xf32> -> vector<16x32xf32>
    %59 = arith.addf %11, %58 : vector<16x32xf32>
    %c0_40 = arith.constant 0 : index
    %c1 = arith.constant 1 : index
    %c0_41 = arith.constant 0 : index
    %c0_42 = arith.constant 0 : index
    %60 = vector.load %arg2[%c0_40, %c1, %c0_41, %c0_42] : memref<1x4x32x8xbf16, #tpu.memory_space<vmem>>, vector<1x1x32x8xbf16>
    %61 = vector.shape_cast %60 : vector<1x1x32x8xbf16> to vector<32x8xbf16>
    %cst_43 = arith.constant dense<0.000000e+00> : vector<16x8xf32>
    %62 = tpu.matmul %4, %61, %cst_43 {dimension_numbers = #tpu.dot_dimension_numbers<[1], [0], [0], [1], [0, 0, 1, 1], [], []>} : vector<16x32xbf16>, vector<32x8xbf16>, vector<16x8xf32> -> vector<16x8xf32>
    %c0_44 = arith.constant 0 : index
    %c1_45 = arith.constant 1 : index
    %c0_46 = arith.constant 0 : index
    %c0_47 = arith.constant 0 : index
    %63 = vector.load %arg3[%c0_44, %c1_45, %c0_46, %c0_47] : memref<1x4x1x8xf32, #tpu.memory_space<vmem>>, vector<1x1x1x8xf32>
    %64 = vector.shape_cast %63 : vector<1x1x1x8xf32> to vector<1x8xf32>
    %65 = vector.broadcast %64 : vector<1x8xf32> to vector<16x8xf32>
    %66 = arith.addf %62, %65 : vector<16x8xf32>
    %67 = vector.shape_cast %66 : vector<16x8xf32> to vector<2x8x8xf32>
    %c0_48 = arith.constant 0 : index
    %c1_49 = arith.constant 1 : index
    %c0_50 = arith.constant 0 : index
    %c0_51 = arith.constant 0 : index
    %68 = vector.load %arg4[%c0_48, %c1_49, %c0_50, %c0_51] : memref<1x4x32x8xbf16, #tpu.memory_space<vmem>>, vector<1x1x32x8xbf16>
    %69 = vector.shape_cast %68 : vector<1x1x32x8xbf16> to vector<32x8xbf16>
    %cst_52 = arith.constant dense<0.000000e+00> : vector<16x8xf32>
    %70 = tpu.matmul %4, %69, %cst_52 {dimension_numbers = #tpu.dot_dimension_numbers<[1], [0], [0], [1], [0, 0, 1, 1], [], []>} : vector<16x32xbf16>, vector<32x8xbf16>, vector<16x8xf32> -> vector<16x8xf32>
    %c0_53 = arith.constant 0 : index
    %c1_54 = arith.constant 1 : index
    %c0_55 = arith.constant 0 : index
    %c0_56 = arith.constant 0 : index
    %71 = vector.load %arg5[%c0_53, %c1_54, %c0_55, %c0_56] : memref<1x4x1x8xf32, #tpu.memory_space<vmem>>, vector<1x1x1x8xf32>
    %72 = vector.shape_cast %71 : vector<1x1x1x8xf32> to vector<1x8xf32>
    %73 = vector.broadcast %72 : vector<1x8xf32> to vector<16x8xf32>
    %74 = arith.addf %70, %73 : vector<16x8xf32>
    %75 = vector.shape_cast %74 : vector<16x8xf32> to vector<2x8x8xf32>
    %c0_57 = arith.constant 0 : index
    %c1_58 = arith.constant 1 : index
    %c0_59 = arith.constant 0 : index
    %c0_60 = arith.constant 0 : index
    %76 = vector.load %arg6[%c0_57, %c1_58, %c0_59, %c0_60] : memref<1x4x32x8xbf16, #tpu.memory_space<vmem>>, vector<1x1x32x8xbf16>
    %77 = vector.shape_cast %76 : vector<1x1x32x8xbf16> to vector<32x8xbf16>
    %cst_61 = arith.constant dense<0.000000e+00> : vector<16x8xf32>
    %78 = tpu.matmul %4, %77, %cst_61 {dimension_numbers = #tpu.dot_dimension_numbers<[1], [0], [0], [1], [0, 0, 1, 1], [], []>} : vector<16x32xbf16>, vector<32x8xbf16>, vector<16x8xf32> -> vector<16x8xf32>
    %c0_62 = arith.constant 0 : index
    %c1_63 = arith.constant 1 : index
    %c0_64 = arith.constant 0 : index
    %c0_65 = arith.constant 0 : index
    %79 = vector.load %arg7[%c0_62, %c1_63, %c0_64, %c0_65] : memref<1x4x1x8xf32, #tpu.memory_space<vmem>>, vector<1x1x1x8xf32>
    %80 = vector.shape_cast %79 : vector<1x1x1x8xf32> to vector<1x8xf32>
    %81 = vector.broadcast %80 : vector<1x8xf32> to vector<16x8xf32>
    %82 = arith.addf %78, %81 : vector<16x8xf32>
    %83 = vector.shape_cast %82 : vector<16x8xf32> to vector<2x8x8xf32>
    %84 = arith.truncf %67 : vector<2x8x8xf32> to vector<2x8x8xbf16>
    %85 = arith.truncf %75 : vector<2x8x8xf32> to vector<2x8x8xbf16>
    "tpu.trace_start"() <{level = 10 : i32, message = "bqd,bkd->bqk"}> : () -> ()
    %cst_66 = arith.constant dense<0.000000e+00> : vector<2x8x8xf32>
    %86 = tpu.matmul %84, %85, %cst_66 {dimension_numbers = #tpu.dot_dimension_numbers<[2], [2], [1], [1], [0, 0, 0, 1, 1, 1], [0], [0]>} : vector<2x8x8xbf16>, vector<2x8x8xbf16>, vector<2x8x8xf32> -> vector<2x8x8xf32>
    "tpu.trace_stop"() : () -> ()
    %87 = vector.broadcast %10 : vector<1x1x8xf32> to vector<2x8x8xf32>
    %88 = arith.addf %86, %87 : vector<2x8x8xf32>
    %cst_67 = arith.constant dense<0xFF800000> : vector<2x8xf32>
    %89 = vector.multi_reduction <maximumf>, %88, %cst_67 [2] : vector<2x8x8xf32> to vector<2x8xf32>
    %90 = vector.shape_cast %89 : vector<2x8xf32> to vector<2x8x1xf32>
    %91 = vector.broadcast %90 : vector<2x8x1xf32> to vector<2x8x8xf32>
    %92 = arith.subf %88, %91 : vector<2x8x8xf32>
    %93 = math.exp %92 : vector<2x8x8xf32>
    %cst_68 = arith.constant dense<0.000000e+00> : vector<2x8xf32>
    %94 = vector.multi_reduction <add>, %93, %cst_68 [2] : vector<2x8x8xf32> to vector<2x8xf32>
    %95 = vector.shape_cast %94 : vector<2x8xf32> to vector<2x8x1xf32>
    %96 = tpu.reciprocal %95 {approx = true} : vector<2x8x1xf32> -> vector<2x8x1xf32>
    %97 = vector.broadcast %96 : vector<2x8x1xf32> to vector<2x8x8xf32>
    %98 = arith.mulf %93, %97 : vector<2x8x8xf32>
    %99 = arith.truncf %98 : vector<2x8x8xf32> to vector<2x8x8xbf16>
    %100 = arith.truncf %83 : vector<2x8x8xf32> to vector<2x8x8xbf16>
    "tpu.trace_start"() <{level = 10 : i32, message = "bqk,bkd->bqd"}> : () -> ()
    %cst_69 = arith.constant dense<0.000000e+00> : vector<2x8x8xf32>
    %101 = tpu.matmul %99, %100, %cst_69 {dimension_numbers = #tpu.dot_dimension_numbers<[2], [1], [1], [2], [0, 0, 0, 1, 1, 2], [0], [0]>} : vector<2x8x8xbf16>, vector<2x8x8xbf16>, vector<2x8x8xf32> -> vector<2x8x8xf32>
    "tpu.trace_stop"() : () -> ()
    %102 = vector.shape_cast %101 : vector<2x8x8xf32> to vector<16x8xf32>
    %103 = arith.truncf %102 : vector<16x8xf32> to vector<16x8xbf16>
    %c0_70 = arith.constant 0 : index
    %c1_71 = arith.constant 1 : index
    %c0_72 = arith.constant 0 : index
    %c0_73 = arith.constant 0 : index
    %104 = vector.load %arg8[%c0_70, %c1_71, %c0_72, %c0_73] : memref<1x4x8x32xbf16, #tpu.memory_space<vmem>>, vector<1x1x8x32xbf16>
    %105 = vector.shape_cast %104 : vector<1x1x8x32xbf16> to vector<8x32xbf16>
    %cst_74 = arith.constant dense<0.000000e+00> : vector<16x32xf32>
    %106 = tpu.matmul %103, %105, %cst_74 {dimension_numbers = #tpu.dot_dimension_numbers<[1], [0], [0], [1], [0, 0, 1, 1], [], []>} : vector<16x8xbf16>, vector<8x32xbf16>, vector<16x32xf32> -> vector<16x32xf32>
    %107 = arith.addf %59, %106 : vector<16x32xf32>
    %c0_75 = arith.constant 0 : index
    %c2 = arith.constant 2 : index
    %c0_76 = arith.constant 0 : index
    %c0_77 = arith.constant 0 : index
    %108 = vector.load %arg2[%c0_75, %c2, %c0_76, %c0_77] : memref<1x4x32x8xbf16, #tpu.memory_space<vmem>>, vector<1x1x32x8xbf16>
    %109 = vector.shape_cast %108 : vector<1x1x32x8xbf16> to vector<32x8xbf16>
    %cst_78 = arith.constant dense<0.000000e+00> : vector<16x8xf32>
    %110 = tpu.matmul %4, %109, %cst_78 {dimension_numbers = #tpu.dot_dimension_numbers<[1], [0], [0], [1], [0, 0, 1, 1], [], []>} : vector<16x32xbf16>, vector<32x8xbf16>, vector<16x8xf32> -> vector<16x8xf32>
    %c0_79 = arith.constant 0 : index
    %c2_80 = arith.constant 2 : index
    %c0_81 = arith.constant 0 : index
    %c0_82 = arith.constant 0 : index
    %111 = vector.load %arg3[%c0_79, %c2_80, %c0_81, %c0_82] : memref<1x4x1x8xf32, #tpu.memory_space<vmem>>, vector<1x1x1x8xf32>
    %112 = vector.shape_cast %111 : vector<1x1x1x8xf32> to vector<1x8xf32>
    %113 = vector.broadcast %112 : vector<1x8xf32> to vector<16x8xf32>
    %114 = arith.addf %110, %113 : vector<16x8xf32>
    %115 = vector.shape_cast %114 : vector<16x8xf32> to vector<2x8x8xf32>
    %c0_83 = arith.constant 0 : index
    %c2_84 = arith.constant 2 : index
    %c0_85 = arith.constant 0 : index
    %c0_86 = arith.constant 0 : index
    %116 = vector.load %arg4[%c0_83, %c2_84, %c0_85, %c0_86] : memref<1x4x32x8xbf16, #tpu.memory_space<vmem>>, vector<1x1x32x8xbf16>
    %117 = vector.shape_cast %116 : vector<1x1x32x8xbf16> to vector<32x8xbf16>
    %cst_87 = arith.constant dense<0.000000e+00> : vector<16x8xf32>
    %118 = tpu.matmul %4, %117, %cst_87 {dimension_numbers = #tpu.dot_dimension_numbers<[1], [0], [0], [1], [0, 0, 1, 1], [], []>} : vector<16x32xbf16>, vector<32x8xbf16>, vector<16x8xf32> -> vector<16x8xf32>
    %c0_88 = arith.constant 0 : index
    %c2_89 = arith.constant 2 : index
    %c0_90 = arith.constant 0 : index
    %c0_91 = arith.constant 0 : index
    %119 = vector.load %arg5[%c0_88, %c2_89, %c0_90, %c0_91] : memref<1x4x1x8xf32, #tpu.memory_space<vmem>>, vector<1x1x1x8xf32>
    %120 = vector.shape_cast %119 : vector<1x1x1x8xf32> to vector<1x8xf32>
    %121 = vector.broadcast %120 : vector<1x8xf32> to vector<16x8xf32>
    %122 = arith.addf %118, %121 : vector<16x8xf32>
    %123 = vector.shape_cast %122 : vector<16x8xf32> to vector<2x8x8xf32>
    %c0_92 = arith.constant 0 : index
    %c2_93 = arith.constant 2 : index
    %c0_94 = arith.constant 0 : index
    %c0_95 = arith.constant 0 : index
    %124 = vector.load %arg6[%c0_92, %c2_93, %c0_94, %c0_95] : memref<1x4x32x8xbf16, #tpu.memory_space<vmem>>, vector<1x1x32x8xbf16>
    %125 = vector.shape_cast %124 : vector<1x1x32x8xbf16> to vector<32x8xbf16>
    %cst_96 = arith.constant dense<0.000000e+00> : vector<16x8xf32>
    %126 = tpu.matmul %4, %125, %cst_96 {dimension_numbers = #tpu.dot_dimension_numbers<[1], [0], [0], [1], [0, 0, 1, 1], [], []>} : vector<16x32xbf16>, vector<32x8xbf16>, vector<16x8xf32> -> vector<16x8xf32>
    %c0_97 = arith.constant 0 : index
    %c2_98 = arith.constant 2 : index
    %c0_99 = arith.constant 0 : index
    %c0_100 = arith.constant 0 : index
    %127 = vector.load %arg7[%c0_97, %c2_98, %c0_99, %c0_100] : memref<1x4x1x8xf32, #tpu.memory_space<vmem>>, vector<1x1x1x8xf32>
    %128 = vector.shape_cast %127 : vector<1x1x1x8xf32> to vector<1x8xf32>
    %129 = vector.broadcast %128 : vector<1x8xf32> to vector<16x8xf32>
    %130 = arith.addf %126, %129 : vector<16x8xf32>
    %131 = vector.shape_cast %130 : vector<16x8xf32> to vector<2x8x8xf32>
    %132 = arith.truncf %115 : vector<2x8x8xf32> to vector<2x8x8xbf16>
    %133 = arith.truncf %123 : vector<2x8x8xf32> to vector<2x8x8xbf16>
    "tpu.trace_start"() <{level = 10 : i32, message = "bqd,bkd->bqk"}> : () -> ()
    %cst_101 = arith.constant dense<0.000000e+00> : vector<2x8x8xf32>
    %134 = tpu.matmul %132, %133, %cst_101 {dimension_numbers = #tpu.dot_dimension_numbers<[2], [2], [1], [1], [0, 0, 0, 1, 1, 1], [0], [0]>} : vector<2x8x8xbf16>, vector<2x8x8xbf16>, vector<2x8x8xf32> -> vector<2x8x8xf32>
    "tpu.trace_stop"() : () -> ()
    %135 = vector.broadcast %10 : vector<1x1x8xf32> to vector<2x8x8xf32>
    %136 = arith.addf %134, %135 : vector<2x8x8xf32>
    %cst_102 = arith.constant dense<0xFF800000> : vector<2x8xf32>
    %137 = vector.multi_reduction <maximumf>, %136, %cst_102 [2] : vector<2x8x8xf32> to vector<2x8xf32>
    %138 = vector.shape_cast %137 : vector<2x8xf32> to vector<2x8x1xf32>
    %139 = vector.broadcast %138 : vector<2x8x1xf32> to vector<2x8x8xf32>
    %140 = arith.subf %136, %139 : vector<2x8x8xf32>
    %141 = math.exp %140 : vector<2x8x8xf32>
    %cst_103 = arith.constant dense<0.000000e+00> : vector<2x8xf32>
    %142 = vector.multi_reduction <add>, %141, %cst_103 [2] : vector<2x8x8xf32> to vector<2x8xf32>
    %143 = vector.shape_cast %142 : vector<2x8xf32> to vector<2x8x1xf32>
    %144 = tpu.reciprocal %143 {approx = true} : vector<2x8x1xf32> -> vector<2x8x1xf32>
    %145 = vector.broadcast %144 : vector<2x8x1xf32> to vector<2x8x8xf32>
    %146 = arith.mulf %141, %145 : vector<2x8x8xf32>
    %147 = arith.truncf %146 : vector<2x8x8xf32> to vector<2x8x8xbf16>
    %148 = arith.truncf %131 : vector<2x8x8xf32> to vector<2x8x8xbf16>
    "tpu.trace_start"() <{level = 10 : i32, message = "bqk,bkd->bqd"}> : () -> ()
    %cst_104 = arith.constant dense<0.000000e+00> : vector<2x8x8xf32>
    %149 = tpu.matmul %147, %148, %cst_104 {dimension_numbers = #tpu.dot_dimension_numbers<[2], [1], [1], [2], [0, 0, 0, 1, 1, 2], [0], [0]>} : vector<2x8x8xbf16>, vector<2x8x8xbf16>, vector<2x8x8xf32> -> vector<2x8x8xf32>
    "tpu.trace_stop"() : () -> ()
    %150 = vector.shape_cast %149 : vector<2x8x8xf32> to vector<16x8xf32>
    %151 = arith.truncf %150 : vector<16x8xf32> to vector<16x8xbf16>
    %c0_105 = arith.constant 0 : index
    %c2_106 = arith.constant 2 : index
    %c0_107 = arith.constant 0 : index
    %c0_108 = arith.constant 0 : index
    %152 = vector.load %arg8[%c0_105, %c2_106, %c0_107, %c0_108] : memref<1x4x8x32xbf16, #tpu.memory_space<vmem>>, vector<1x1x8x32xbf16>
    %153 = vector.shape_cast %152 : vector<1x1x8x32xbf16> to vector<8x32xbf16>
    %cst_109 = arith.constant dense<0.000000e+00> : vector<16x32xf32>
    %154 = tpu.matmul %151, %153, %cst_109 {dimension_numbers = #tpu.dot_dimension_numbers<[1], [0], [0], [1], [0, 0, 1, 1], [], []>} : vector<16x8xbf16>, vector<8x32xbf16>, vector<16x32xf32> -> vector<16x32xf32>
    %155 = arith.addf %107, %154 : vector<16x32xf32>
    %c0_110 = arith.constant 0 : index
    %c3 = arith.constant 3 : index
    %c0_111 = arith.constant 0 : index
    %c0_112 = arith.constant 0 : index
    %156 = vector.load %arg2[%c0_110, %c3, %c0_111, %c0_112] : memref<1x4x32x8xbf16, #tpu.memory_space<vmem>>, vector<1x1x32x8xbf16>
    %157 = vector.shape_cast %156 : vector<1x1x32x8xbf16> to vector<32x8xbf16>
    %cst_113 = arith.constant dense<0.000000e+00> : vector<16x8xf32>
    %158 = tpu.matmul %4, %157, %cst_113 {dimension_numbers = #tpu.dot_dimension_numbers<[1], [0], [0], [1], [0, 0, 1, 1], [], []>} : vector<16x32xbf16>, vector<32x8xbf16>, vector<16x8xf32> -> vector<16x8xf32>
    %c0_114 = arith.constant 0 : index
    %c3_115 = arith.constant 3 : index
    %c0_116 = arith.constant 0 : index
    %c0_117 = arith.constant 0 : index
    %159 = vector.load %arg3[%c0_114, %c3_115, %c0_116, %c0_117] : memref<1x4x1x8xf32, #tpu.memory_space<vmem>>, vector<1x1x1x8xf32>
    %160 = vector.shape_cast %159 : vector<1x1x1x8xf32> to vector<1x8xf32>
    %161 = vector.broadcast %160 : vector<1x8xf32> to vector<16x8xf32>
    %162 = arith.addf %158, %161 : vector<16x8xf32>
    %163 = vector.shape_cast %162 : vector<16x8xf32> to vector<2x8x8xf32>
    %c0_118 = arith.constant 0 : index
    %c3_119 = arith.constant 3 : index
    %c0_120 = arith.constant 0 : index
    %c0_121 = arith.constant 0 : index
    %164 = vector.load %arg4[%c0_118, %c3_119, %c0_120, %c0_121] : memref<1x4x32x8xbf16, #tpu.memory_space<vmem>>, vector<1x1x32x8xbf16>
    %165 = vector.shape_cast %164 : vector<1x1x32x8xbf16> to vector<32x8xbf16>
    %cst_122 = arith.constant dense<0.000000e+00> : vector<16x8xf32>
    %166 = tpu.matmul %4, %165, %cst_122 {dimension_numbers = #tpu.dot_dimension_numbers<[1], [0], [0], [1], [0, 0, 1, 1], [], []>} : vector<16x32xbf16>, vector<32x8xbf16>, vector<16x8xf32> -> vector<16x8xf32>
    %c0_123 = arith.constant 0 : index
    %c3_124 = arith.constant 3 : index
    %c0_125 = arith.constant 0 : index
    %c0_126 = arith.constant 0 : index
    %167 = vector.load %arg5[%c0_123, %c3_124, %c0_125, %c0_126] : memref<1x4x1x8xf32, #tpu.memory_space<vmem>>, vector<1x1x1x8xf32>
    %168 = vector.shape_cast %167 : vector<1x1x1x8xf32> to vector<1x8xf32>
    %169 = vector.broadcast %168 : vector<1x8xf32> to vector<16x8xf32>
    %170 = arith.addf %166, %169 : vector<16x8xf32>
    %171 = vector.shape_cast %170 : vector<16x8xf32> to vector<2x8x8xf32>
    %c0_127 = arith.constant 0 : index
    %c3_128 = arith.constant 3 : index
    %c0_129 = arith.constant 0 : index
    %c0_130 = arith.constant 0 : index
    %172 = vector.load %arg6[%c0_127, %c3_128, %c0_129, %c0_130] : memref<1x4x32x8xbf16, #tpu.memory_space<vmem>>, vector<1x1x32x8xbf16>
    %173 = vector.shape_cast %172 : vector<1x1x32x8xbf16> to vector<32x8xbf16>
    %cst_131 = arith.constant dense<0.000000e+00> : vector<16x8xf32>
    %174 = tpu.matmul %4, %173, %cst_131 {dimension_numbers = #tpu.dot_dimension_numbers<[1], [0], [0], [1], [0, 0, 1, 1], [], []>} : vector<16x32xbf16>, vector<32x8xbf16>, vector<16x8xf32> -> vector<16x8xf32>
    %c0_132 = arith.constant 0 : index
    %c3_133 = arith.constant 3 : index
    %c0_134 = arith.constant 0 : index
    %c0_135 = arith.constant 0 : index
    %175 = vector.load %arg7[%c0_132, %c3_133, %c0_134, %c0_135] : memref<1x4x1x8xf32, #tpu.memory_space<vmem>>, vector<1x1x1x8xf32>
    %176 = vector.shape_cast %175 : vector<1x1x1x8xf32> to vector<1x8xf32>
    %177 = vector.broadcast %176 : vector<1x8xf32> to vector<16x8xf32>
    %178 = arith.addf %174, %177 : vector<16x8xf32>
    %179 = vector.shape_cast %178 : vector<16x8xf32> to vector<2x8x8xf32>
    %180 = arith.truncf %163 : vector<2x8x8xf32> to vector<2x8x8xbf16>
    %181 = arith.truncf %171 : vector<2x8x8xf32> to vector<2x8x8xbf16>
    "tpu.trace_start"() <{level = 10 : i32, message = "bqd,bkd->bqk"}> : () -> ()
    %cst_136 = arith.constant dense<0.000000e+00> : vector<2x8x8xf32>
    %182 = tpu.matmul %180, %181, %cst_136 {dimension_numbers = #tpu.dot_dimension_numbers<[2], [2], [1], [1], [0, 0, 0, 1, 1, 1], [0], [0]>} : vector<2x8x8xbf16>, vector<2x8x8xbf16>, vector<2x8x8xf32> -> vector<2x8x8xf32>
    "tpu.trace_stop"() : () -> ()
    %183 = vector.broadcast %10 : vector<1x1x8xf32> to vector<2x8x8xf32>
    %184 = arith.addf %182, %183 : vector<2x8x8xf32>
    %cst_137 = arith.constant dense<0xFF800000> : vector<2x8xf32>
    %185 = vector.multi_reduction <maximumf>, %184, %cst_137 [2] : vector<2x8x8xf32> to vector<2x8xf32>
    %186 = vector.shape_cast %185 : vector<2x8xf32> to vector<2x8x1xf32>
    %187 = vector.broadcast %186 : vector<2x8x1xf32> to vector<2x8x8xf32>
    %188 = arith.subf %184, %187 : vector<2x8x8xf32>
    %189 = math.exp %188 : vector<2x8x8xf32>
    %cst_138 = arith.constant dense<0.000000e+00> : vector<2x8xf32>
    %190 = vector.multi_reduction <add>, %189, %cst_138 [2] : vector<2x8x8xf32> to vector<2x8xf32>
    %191 = vector.shape_cast %190 : vector<2x8xf32> to vector<2x8x1xf32>
    %192 = tpu.reciprocal %191 {approx = true} : vector<2x8x1xf32> -> vector<2x8x1xf32>
    %193 = vector.broadcast %192 : vector<2x8x1xf32> to vector<2x8x8xf32>
    %194 = arith.mulf %189, %193 : vector<2x8x8xf32>
    %195 = arith.truncf %194 : vector<2x8x8xf32> to vector<2x8x8xbf16>
    %196 = arith.truncf %179 : vector<2x8x8xf32> to vector<2x8x8xbf16>
    "tpu.trace_start"() <{level = 10 : i32, message = "bqk,bkd->bqd"}> : () -> ()
    %cst_139 = arith.constant dense<0.000000e+00> : vector<2x8x8xf32>
    %197 = tpu.matmul %195, %196, %cst_139 {dimension_numbers = #tpu.dot_dimension_numbers<[2], [1], [1], [2], [0, 0, 0, 1, 1, 2], [0], [0]>} : vector<2x8x8xbf16>, vector<2x8x8xbf16>, vector<2x8x8xf32> -> vector<2x8x8xf32>
    "tpu.trace_stop"() : () -> ()
    %198 = vector.shape_cast %197 : vector<2x8x8xf32> to vector<16x8xf32>
    %199 = arith.truncf %198 : vector<16x8xf32> to vector<16x8xbf16>
    %c0_140 = arith.constant 0 : index
    %c3_141 = arith.constant 3 : index
    %c0_142 = arith.constant 0 : index
    %c0_143 = arith.constant 0 : index
    %200 = vector.load %arg8[%c0_140, %c3_141, %c0_142, %c0_143] : memref<1x4x8x32xbf16, #tpu.memory_space<vmem>>, vector<1x1x8x32xbf16>
    %201 = vector.shape_cast %200 : vector<1x1x8x32xbf16> to vector<8x32xbf16>
    %cst_144 = arith.constant dense<0.000000e+00> : vector<16x32xf32>
    %202 = tpu.matmul %199, %201, %cst_144 {dimension_numbers = #tpu.dot_dimension_numbers<[1], [0], [0], [1], [0, 0, 1, 1], [], []>} : vector<16x8xbf16>, vector<8x32xbf16>, vector<16x32xf32> -> vector<16x32xf32>
    %203 = arith.addf %155, %202 : vector<16x32xf32>
    %c0_145 = arith.constant 0 : index
    %c0_146 = arith.constant 0 : index
    %c0_147 = arith.constant 0 : index
    %204 = vector.load %arg9[%c0_145, %c0_146, %c0_147] : memref<1x1x32xf32, #tpu.memory_space<vmem>>, vector<1x1x32xf32>
    %205 = vector.shape_cast %204 : vector<1x1x32xf32> to vector<1x32xf32>
    %206 = vector.broadcast %205 : vector<1x32xf32> to vector<16x32xf32>
    %207 = arith.addf %203, %206 : vector<16x32xf32>
    %208 = arith.addf %3, %207 : vector<16x32xf32>
    %cst_148 = arith.constant dense<0.000000e+00> : vector<16xf32>
    %209 = vector.multi_reduction <add>, %208, %cst_148 [1] : vector<16x32xf32> to vector<16xf32>
    %210 = vector.shape_cast %209 : vector<16xf32> to vector<16x1xf32>
    %cst_149 = arith.constant 3.200000e+01 : f32
    %211 = vector.broadcast %cst_149 : f32 to vector<16x1xf32>
    %212 = arith.divf %210, %211 : vector<16x1xf32>
    %213 = arith.mulf %208, %208 : vector<16x32xf32>
    %cst_150 = arith.constant dense<0.000000e+00> : vector<16xf32>
    %214 = vector.multi_reduction <add>, %213, %cst_150 [1] : vector<16x32xf32> to vector<16xf32>
    %215 = vector.shape_cast %214 : vector<16xf32> to vector<16x1xf32>
    %cst_151 = arith.constant 3.200000e+01 : f32
    %216 = vector.broadcast %cst_151 : f32 to vector<16x1xf32>
    %217 = arith.divf %215, %216 : vector<16x1xf32>
    %218 = arith.mulf %212, %212 : vector<16x1xf32>
    %219 = arith.subf %217, %218 : vector<16x1xf32>
    %220 = vector.broadcast %212 : vector<16x1xf32> to vector<16x32xf32>
    %221 = arith.subf %208, %220 : vector<16x32xf32>
    %cst_152 = arith.constant 9.99999974E-6 : f32
    %222 = vector.broadcast %cst_152 : f32 to vector<16x1xf32>
    %223 = arith.addf %219, %222 : vector<16x1xf32>
    %224 = math.rsqrt %223 : vector<16x1xf32>
    %225 = vector.broadcast %224 : vector<16x1xf32> to vector<16x32xf32>
    %226 = arith.mulf %221, %225 : vector<16x32xf32>
    %c0_153 = arith.constant 0 : index
    %c0_154 = arith.constant 0 : index
    %c0_155 = arith.constant 0 : index
    %227 = vector.load %arg10[%c0_153, %c0_154, %c0_155] : memref<1x1x32xf32, #tpu.memory_space<vmem>>, vector<1x1x32xf32>
    %228 = vector.shape_cast %227 : vector<1x1x32xf32> to vector<1x32xf32>
    %229 = vector.broadcast %228 : vector<1x32xf32> to vector<16x32xf32>
    %230 = arith.mulf %226, %229 : vector<16x32xf32>
    %c0_156 = arith.constant 0 : index
    %c0_157 = arith.constant 0 : index
    %c0_158 = arith.constant 0 : index
    %231 = vector.load %arg11[%c0_156, %c0_157, %c0_158] : memref<1x1x32xf32, #tpu.memory_space<vmem>>, vector<1x1x32xf32>
    %232 = vector.shape_cast %231 : vector<1x1x32xf32> to vector<1x32xf32>
    %233 = vector.broadcast %232 : vector<1x32xf32> to vector<16x32xf32>
    %234 = arith.addf %230, %233 : vector<16x32xf32>
    %c0_159 = arith.constant 0 : index
    %c0_160 = arith.constant 0 : index
    %c0_161 = arith.constant 0 : index
    %235 = vector.load %arg12[%c0_159, %c0_160, %c0_161] : memref<1x32x64xbf16, #tpu.memory_space<vmem>>, vector<1x32x64xbf16>
    %236 = vector.shape_cast %235 : vector<1x32x64xbf16> to vector<32x64xbf16>
    %c0_162 = arith.constant 0 : index
    %c0_163 = arith.constant 0 : index
    %c0_164 = arith.constant 0 : index
    %237 = vector.load %arg13[%c0_162, %c0_163, %c0_164] : memref<1x1x64xf32, #tpu.memory_space<vmem>>, vector<1x1x64xf32>
    %238 = vector.shape_cast %237 : vector<1x1x64xf32> to vector<1x64xf32>
    %239 = arith.truncf %234 : vector<16x32xf32> to vector<16x32xbf16>
    %cst_165 = arith.constant dense<0.000000e+00> : vector<16x64xf32>
    %240 = tpu.matmul %239, %236, %cst_165 {dimension_numbers = #tpu.dot_dimension_numbers<[1], [0], [0], [1], [0, 0, 1, 1], [], []>} : vector<16x32xbf16>, vector<32x64xbf16>, vector<16x64xf32> -> vector<16x64xf32>
    %241 = vector.broadcast %238 : vector<1x64xf32> to vector<16x64xf32>
    %242 = arith.addf %240, %241 : vector<16x64xf32>
    %cst_166 = arith.constant 0.000000e+00 : f32
    %243 = vector.broadcast %cst_166 : f32 to vector<16x64xf32>
    %244 = arith.maximumf %242, %243 : vector<16x64xf32>
    %c0_167 = arith.constant 0 : index
    %c0_168 = arith.constant 0 : index
    %c0_169 = arith.constant 0 : index
    %245 = vector.load %arg14[%c0_167, %c0_168, %c0_169] : memref<1x64x32xbf16, #tpu.memory_space<vmem>>, vector<1x64x32xbf16>
    %246 = vector.shape_cast %245 : vector<1x64x32xbf16> to vector<64x32xbf16>
    %c0_170 = arith.constant 0 : index
    %c0_171 = arith.constant 0 : index
    %c0_172 = arith.constant 0 : index
    %247 = vector.load %arg15[%c0_170, %c0_171, %c0_172] : memref<1x1x32xf32, #tpu.memory_space<vmem>>, vector<1x1x32xf32>
    %248 = vector.shape_cast %247 : vector<1x1x32xf32> to vector<1x32xf32>
    %249 = arith.truncf %244 : vector<16x64xf32> to vector<16x64xbf16>
    %cst_173 = arith.constant dense<0.000000e+00> : vector<16x32xf32>
    %250 = tpu.matmul %249, %246, %cst_173 {dimension_numbers = #tpu.dot_dimension_numbers<[1], [0], [0], [1], [0, 0, 1, 1], [], []>} : vector<16x64xbf16>, vector<64x32xbf16>, vector<16x32xf32> -> vector<16x32xf32>
    %251 = vector.broadcast %248 : vector<1x32xf32> to vector<16x32xf32>
    %252 = arith.addf %250, %251 : vector<16x32xf32>
    %253 = arith.addf %234, %252 : vector<16x32xf32>
    %cst_174 = arith.constant dense<0.000000e+00> : vector<16xf32>
    %254 = vector.multi_reduction <add>, %253, %cst_174 [1] : vector<16x32xf32> to vector<16xf32>
    %255 = vector.shape_cast %254 : vector<16xf32> to vector<16x1xf32>
    %cst_175 = arith.constant 3.200000e+01 : f32
    %256 = vector.broadcast %cst_175 : f32 to vector<16x1xf32>
    %257 = arith.divf %255, %256 : vector<16x1xf32>
    %258 = arith.mulf %253, %253 : vector<16x32xf32>
    %cst_176 = arith.constant dense<0.000000e+00> : vector<16xf32>
    %259 = vector.multi_reduction <add>, %258, %cst_176 [1] : vector<16x32xf32> to vector<16xf32>
    %260 = vector.shape_cast %259 : vector<16xf32> to vector<16x1xf32>
    %cst_177 = arith.constant 3.200000e+01 : f32
    %261 = vector.broadcast %cst_177 : f32 to vector<16x1xf32>
    %262 = arith.divf %260, %261 : vector<16x1xf32>
    %263 = arith.mulf %257, %257 : vector<16x1xf32>
    %264 = arith.subf %262, %263 : vector<16x1xf32>
    %265 = vector.broadcast %257 : vector<16x1xf32> to vector<16x32xf32>
    %266 = arith.subf %253, %265 : vector<16x32xf32>
    %cst_178 = arith.constant 9.99999974E-6 : f32
    %267 = vector.broadcast %cst_178 : f32 to vector<16x1xf32>
    %268 = arith.addf %264, %267 : vector<16x1xf32>
    %269 = math.rsqrt %268 : vector<16x1xf32>
    %270 = vector.broadcast %269 : vector<16x1xf32> to vector<16x32xf32>
    %271 = arith.mulf %266, %270 : vector<16x32xf32>
    %c0_179 = arith.constant 0 : index
    %c0_180 = arith.constant 0 : index
    %c0_181 = arith.constant 0 : index
    %272 = vector.load %arg16[%c0_179, %c0_180, %c0_181] : memref<1x1x32xf32, #tpu.memory_space<vmem>>, vector<1x1x32xf32>
    %273 = vector.shape_cast %272 : vector<1x1x32xf32> to vector<1x32xf32>
    %274 = vector.broadcast %273 : vector<1x32xf32> to vector<16x32xf32>
    %275 = arith.mulf %271, %274 : vector<16x32xf32>
    %c0_182 = arith.constant 0 : index
    %c0_183 = arith.constant 0 : index
    %c0_184 = arith.constant 0 : index
    %276 = vector.load %arg17[%c0_182, %c0_183, %c0_184] : memref<1x1x32xf32, #tpu.memory_space<vmem>>, vector<1x1x32xf32>
    %277 = vector.shape_cast %276 : vector<1x1x32xf32> to vector<1x32xf32>
    %278 = vector.broadcast %277 : vector<1x32xf32> to vector<16x32xf32>
    %279 = arith.addf %275, %278 : vector<16x32xf32>
    %c0_185 = arith.constant 0 : index
    %c0_186 = arith.constant 0 : index
    %280 = vector.load %arg25[%c0_185, %c0_186] : memref<16x32xf32, #tpu.memory_space<vmem>>, vector<16x32xf32>
    tpu.vector_store %arg25[%c0_185, %c0_186], %279 {strides = array<i32>} : memref<16x32xf32, #tpu.memory_space<vmem>>, vector<16x32xf32>,
    %c1_i32 = arith.constant 1 : i32
    %281 = arith.cmpi eq, %arg0, %c1_i32 : i32
    %282 = arith.extui %281 : i1 to i32
    %c0_i32_187 = arith.constant 0 : i32
    %283 = arith.cmpi ne, %282, %c0_i32_187 : i32
    scf.if %283 {
      %284 = vector.shape_cast %279 : vector<16x32xf32> to vector<2x8x32xf32>
      %285 = vector.extract_strided_slice %284 {offsets = [0, 0, 0], sizes = [2, 1, 32], strides = [1, 1, 1]} : vector<2x8x32xf32> to vector<2x1x32xf32>
      %286 = vector.shape_cast %285 : vector<2x1x32xf32> to vector<2x32xf32>
      %c0_188 = arith.constant 0 : index
      %c0_189 = arith.constant 0 : index
      %287 = vector.load %arg18[%c0_188, %c0_189] : memref<32x512xbf16, #tpu.memory_space<vmem>>, vector<32x512xbf16>
      %c0_190 = arith.constant 0 : index
      %c0_191 = arith.constant 0 : index
      %288 = vector.load %arg19[%c0_190, %c0_191] : memref<1x512xf32, #tpu.memory_space<vmem>>, vector<1x512xf32>
      %289 = arith.truncf %286 : vector<2x32xf32> to vector<2x32xbf16>
      %cst_192 = arith.constant dense<0.000000e+00> : vector<2x512xf32>
      %290 = tpu.matmul %289, %287, %cst_192 {dimension_numbers = #tpu.dot_dimension_numbers<[1], [0], [0], [1], [0, 0, 1, 1], [], []>} : vector<2x32xbf16>, vector<32x512xbf16>, vector<2x512xf32> -> vector<2x512xf32>
      %291 = vector.broadcast %288 : vector<1x512xf32> to vector<2x512xf32>
      %292 = arith.addf %290, %291 : vector<2x512xf32>
      %cst_193 = arith.constant 0.000000e+00 : f32
      %293 = vector.broadcast %cst_193 : f32 to vector<2x512xf32>
      %294 = arith.maximumf %292, %293 : vector<2x512xf32>
      %c0_194 = arith.constant 0 : index
      %c0_195 = arith.constant 0 : index
      %295 = vector.load %arg20[%c0_194, %c0_195] : memref<512x256xbf16, #tpu.memory_space<vmem>>, vector<512x256xbf16>
      %c0_196 = arith.constant 0 : index
      %c0_197 = arith.constant 0 : index
      %296 = vector.load %arg21[%c0_196, %c0_197] : memref<1x256xf32, #tpu.memory_space<vmem>>, vector<1x256xf32>
      %297 = arith.truncf %294 : vector<2x512xf32> to vector<2x512xbf16>
      %cst_198 = arith.constant dense<0.000000e+00> : vector<2x256xf32>
      %298 = tpu.matmul %297, %295, %cst_198 {dimension_numbers = #tpu.dot_dimension_numbers<[1], [0], [0], [1], [0, 0, 1, 1], [], []>} : vector<2x512xbf16>, vector<512x256xbf16>, vector<2x256xf32> -> vector<2x256xf32>
      %299 = vector.broadcast %296 : vector<1x256xf32> to vector<2x256xf32>
      %300 = arith.addf %298, %299 : vector<2x256xf32>
      %cst_199 = arith.constant 0.000000e+00 : f32
      %301 = vector.broadcast %cst_199 : f32 to vector<2x256xf32>
      %302 = arith.maximumf %300, %301 : vector<2x256xf32>
      %c0_200 = arith.constant 0 : index
      %c0_201 = arith.constant 0 : index
      %303 = vector.load %arg22[%c0_200, %c0_201] : memref<256x128xbf16, #tpu.memory_space<vmem>>, vector<256x128xbf16>
      %c0_202 = arith.constant 0 : index
      %c0_203 = arith.constant 0 : index
      %304 = vector.load %arg23[%c0_202, %c0_203] : memref<1x128xf32, #tpu.memory_space<vmem>>, vector<1x128xf32>
      %305 = arith.truncf %302 : vector<2x256xf32> to vector<2x256xbf16>
      %cst_204 = arith.constant dense<0.000000e+00> : vector<2x128xf32>
      %306 = tpu.matmul %305, %303, %cst_204 {dimension_numbers = #tpu.dot_dimension_numbers<[1], [0], [0], [1], [0, 0, 1, 1], [], []>} : vector<2x256xbf16>, vector<256x128xbf16>, vector<2x128xf32> -> vector<2x128xf32>
      %307 = vector.broadcast %304 : vector<1x128xf32> to vector<2x128xf32>
      %308 = arith.addf %306, %307 : vector<2x128xf32>
      %c0_205 = arith.constant 0 : index
      %c0_206 = arith.constant 0 : index
      %309 = vector.load %arg24[%c0_205, %c0_206] : memref<2x128xf32, #tpu.memory_space<vmem>>, vector<2x128xf32>
      tpu.vector_store %arg24[%c0_205, %c0_206], %308 {strides = array<i32>} : memref<2x128xf32, #tpu.memory_space<vmem>>, vector<2x128xf32>,
    } else {
    }
    return
  }
  func.func @transform_0(%arg0: i32) -> (i32, i32) {
    %c0_i32 = arith.constant 0 : i32
    %c0_i32_0 = arith.constant 0 : i32
    %c0_i32_1 = arith.constant 0 : i32
    return %c0_i32, %c0_i32_0 : i32, i32
  }
  func.func @transform_1(%arg0: i32) -> (i32, i32, i32, i32) {
    %c0_i32 = arith.constant 0 : i32
    %c0_i32_0 = arith.constant 0 : i32
    %c0_i32_1 = arith.constant 0 : i32
    %c0_i32_2 = arith.constant 0 : i32
    return %arg0, %c0_i32, %c0_i32_0, %c0_i32_1 : i32, i32, i32, i32
  }
  func.func @transform_2(%arg0: i32) -> (i32, i32, i32, i32) {
    %c0_i32 = arith.constant 0 : i32
    %c0_i32_0 = arith.constant 0 : i32
    %c0_i32_1 = arith.constant 0 : i32
    %c0_i32_2 = arith.constant 0 : i32
    return %arg0, %c0_i32, %c0_i32_0, %c0_i32_1 : i32, i32, i32, i32
  }
  func.func @transform_3(%arg0: i32) -> (i32, i32, i32, i32) {
    %c0_i32 = arith.constant 0 : i32
    %c0_i32_0 = arith.constant 0 : i32
    %c0_i32_1 = arith.constant 0 : i32
    %c0_i32_2 = arith.constant 0 : i32
    return %arg0, %c0_i32, %c0_i32_0, %c0_i32_1 : i32, i32, i32, i32
  }
  func.func @transform_4(%arg0: i32) -> (i32, i32, i32, i32) {
    %c0_i32 = arith.constant 0 : i32
    %c0_i32_0 = arith.constant 0 : i32
    %c0_i32_1 = arith.constant 0 : i32
    %c0_i32_2 = arith.constant 0 : i32
    return %arg0, %c0_i32, %c0_i32_0, %c0_i32_1 : i32, i32, i32, i32
  }
  func.func @transform_5(%arg0: i32) -> (i32, i32, i32, i32) {
    %c0_i32 = arith.constant 0 : i32
    %c0_i32_0 = arith.constant 0 : i32
    %c0_i32_1 = arith.constant 0 : i32
    %c0_i32_2 = arith.constant 0 : i32
    return %arg0, %c0_i32, %c0_i32_0, %c0_i32_1 : i32, i32, i32, i32
  }
  func.func @transform_6(%arg0: i32) -> (i32, i32, i32, i32) {
    %c0_i32 = arith.constant 0 : i32
    %c0_i32_0 = arith.constant 0 : i32
    %c0_i32_1 = arith.constant 0 : i32
    %c0_i32_2 = arith.constant 0 : i32
    return %arg0, %c0_i32, %c0_i32_0, %c0_i32_1 : i32, i32, i32, i32
  }
  func.func @transform_7(%arg0: i32) -> (i32, i32, i32, i32) {
    %c0_i32 = arith.constant 0 : i32
    %c0_i32_0 = arith.constant 0 : i32
    %c0_i32_1 = arith.constant 0 : i32
    %c0_i32_2 = arith.constant 0 : i32
    return %arg0, %c0_i32, %c0_i32_0, %c0_i32_1 : i32, i32, i32, i32
  }
  func.func @transform_8(%arg0: i32) -> (i32, i32, i32) {
    %c0_i32 = arith.constant 0 : i32
    %c0_i32_0 = arith.constant 0 : i32
    %c0_i32_1 = arith.constant 0 : i32
    return %arg0, %c0_i32, %c0_i32_0 : i32, i32, i32
  }
  func.func @transform_9(%arg0: i32) -> (i32, i32, i32) {
    %c0_i32 = arith.constant 0 : i32
    %c0_i32_0 = arith.constant 0 : i32
    %c0_i32_1 = arith.constant 0 : i32
    return %arg0, %c0_i32, %c0_i32_0 : i32, i32, i32
  }
  func.func @transform_10(%arg0: i32) -> (i32, i32, i32) {
    %c0_i32 = arith.constant 0 : i32
    %c0_i32_0 = arith.constant 0 : i32
    %c0_i32_1 = arith.constant 0 : i32
    return %arg0, %c0_i32, %c0_i32_0 : i32, i32, i32
  }
  func.func @transform_11(%arg0: i32) -> (i32, i32, i32) {
    %c0_i32 = arith.constant 0 : i32
    %c0_i32_0 = arith.constant 0 : i32
    %c0_i32_1 = arith.constant 0 : i32
    return %arg0, %c0_i32, %c0_i32_0 : i32, i32, i32
  }
  func.func @transform_12(%arg0: i32) -> (i32, i32, i32) {
    %c0_i32 = arith.constant 0 : i32
    %c0_i32_0 = arith.constant 0 : i32
    %c0_i32_1 = arith.constant 0 : i32
    return %arg0, %c0_i32, %c0_i32_0 : i32, i32, i32
  }
  func.func @transform_13(%arg0: i32) -> (i32, i32, i32) {
    %c0_i32 = arith.constant 0 : i32
    %c0_i32_0 = arith.constant 0 : i32
    %c0_i32_1 = arith.constant 0 : i32
    return %arg0, %c0_i32, %c0_i32_0 : i32, i32, i32
  }
  func.func @transform_14(%arg0: i32) -> (i32, i32, i32) {
    %c0_i32 = arith.constant 0 : i32
    %c0_i32_0 = arith.constant 0 : i32
    %c0_i32_1 = arith.constant 0 : i32
    return %arg0, %c0_i32, %c0_i32_0 : i32, i32, i32
  }
  func.func @transform_15(%arg0: i32) -> (i32, i32, i32) {
    %c0_i32 = arith.constant 0 : i32
    %c0_i32_0 = arith.constant 0 : i32
    %c0_i32_1 = arith.constant 0 : i32
    return %arg0, %c0_i32, %c0_i32_0 : i32, i32, i32
  }
  func.func @transform_16(%arg0: i32) -> (i32, i32, i32) {
    %c0_i32 = arith.constant 0 : i32
    %c0_i32_0 = arith.constant 0 : i32
    %c0_i32_1 = arith.constant 0 : i32
    return %arg0, %c0_i32, %c0_i32_0 : i32, i32, i32
  }
  func.func @transform_17(%arg0: i32) -> (i32, i32) {
    %c0_i32 = arith.constant 0 : i32
    %c0_i32_0 = arith.constant 0 : i32
    %c0_i32_1 = arith.constant 0 : i32
    return %c0_i32, %c0_i32_0 : i32, i32
  }
  func.func @transform_18(%arg0: i32) -> (i32, i32) {
    %c0_i32 = arith.constant 0 : i32
    %c0_i32_0 = arith.constant 0 : i32
    %c0_i32_1 = arith.constant 0 : i32
    return %c0_i32, %c0_i32_0 : i32, i32
  }
  func.func @transform_19(%arg0: i32) -> (i32, i32) {
    %c0_i32 = arith.constant 0 : i32
    %c0_i32_0 = arith.constant 0 : i32
    %c0_i32_1 = arith.constant 0 : i32
    return %c0_i32, %c0_i32_0 : i32, i32
  }
  func.func @transform_20(%arg0: i32) -> (i32, i32) {
    %c0_i32 = arith.constant 0 : i32
    %c0_i32_0 = arith.constant 0 : i32
    %c0_i32_1 = arith.constant 0 : i32
    return %c0_i32, %c0_i32_0 : i32, i32
  }
  func.func @transform_21(%arg0: i32) -> (i32, i32) {
    %c0_i32 = arith.constant 0 : i32
    %c0_i32_0 = arith.constant 0 : i32
    %c0_i32_1 = arith.constant 0 : i32
    return %c0_i32, %c0_i32_0 : i32, i32
  }
  func.func @transform_22(%arg0: i32) -> (i32, i32) {
    %c0_i32 = arith.constant 0 : i32
    %c0_i32_0 = arith.constant 0 : i32
    %c0_i32_1 = arith.constant 0 : i32
    return %c0_i32, %c0_i32_0 : i32, i32
  }
  func.func @transform_23(%arg0: i32) -> (i32, i32) {
    %c0_i32 = arith.constant 0 : i32
    %c0_i32_0 = arith.constant 0 : i32
    %c0_i32_1 = arith.constant 0 : i32
    return %c0_i32, %c0_i32_0 : i32, i32
  }
}

</mosaic_0001>

<bundles_post_ra>
// kernel: vit_forward.2
= control target key start
LH: loop header
LB: loop body
LE: loop exit
PB: predicated region body
PF: predicated region fallthrough
CT: control target
= control target key end

     0   :  { %vm180_vm0 = vcmask 261120   ;;  %s344_s1 = inlined_call_operand.vmem [shape: bf16[256,32], index: 1, kind: input, shape index: {}]   ;;  %s345_s2 = inlined_call_operand.vmem [shape: f32[1,32], index: 2, kind: input, shape index: {}]   ;;  %s346_s0 = inlined_call_operand.vmem [shape: bf16[8,256], index: 0, kind: input, shape index: {}]   ;;  %s347_s3 = inlined_call_operand.vmem [shape: f32[8,32], index: 3, kind: output, shape index: {}]  }
   0x1   :  { %v257_v0 = vld [vmem:[%s344_s1 + $0x38] sm:$0xff]  ;;  %v256_v2 = vld [vmem:[%s344_s1 + $0x30] sm:$0xff]  ;;  %v255_v4 = vld [vmem:[%s344_s1 + $0x28] sm:$0xff] }
   0x2   :  { %v265_v1 = vld [vmem:[%s344_s1 + $0x78] sm:$0xff]  ;;  %154 = vmatpush.bf16.msra.mxu0 %v257_v0  ;;  %v264_v3 = vld [vmem:[%s344_s1 + $0x70] sm:$0xff]  ;;  %v263_v5 = vld [vmem:[%s344_s1 + $0x68] sm:$0xff] }
   0x3   :  { %167 = vmatpush.bf16.msra.mxu1 %v265_v1  ;;  %v254_v6 = vld [vmem:[%s344_s1 + $0x20] sm:$0xff]  ;;  %v253_v8 = vld [vmem:[%s344_s1 + $0x18] sm:$0xff]  ;;  %v252_v10 = vld [vmem:[%s344_s1 + $0x10] sm:$0xff] }
   0x4   :  { %v262_v7 = vld [vmem:[%s344_s1 + $0x60] sm:$0xff]  ;;  %v261_v9 = vld [vmem:[%s344_s1 + $0x58] sm:$0xff]  ;;  %v260_v11 = vld [vmem:[%s344_s1 + $0x50] sm:$0xff] }
   0x5   :  { %v251_v12 = vld [vmem:[%s344_s1 + $0x8] sm:$0xff]  ;;  %v14_v14 = vld [vmem:[%s346_s0] sm:$0xff] }
   0x6   :  { %155 = vmatpush.bf16.msra.mxu0 %v256_v2  ;;  %v259_v13 = vld [vmem:[%s344_s1 + $0x48] sm:$0xff]  ;;  %v52_v15 = vunpack.c.l.b16 %v14_v14  ;;  %v53_v16 = vunpack.c.h.b16 %v14_v14  ;;  %v250_v17 = vld [vmem:[%s344_s1] sm:$0xff] }
   0x7   :  { %168 = vmatpush.bf16.msra.mxu1 %v264_v3  ;;  %v258_v18 = vld [vmem:[%s344_s1 + $0x40] sm:$0xff] }
   0x8   :  { %v54_v19 = vpack.c.b16 %v52_v15, %v52_v15  ;;  %v55_v20 = vpack.c.b16 %v53_v16, %v53_v16  ;;  %v266_v21 = vld [vmem:[%s345_s2] ss:$0 sm:$0xff] }
   0xa   :  { %156 = vmatpush.bf16.msra.mxu0 %v255_v4 }
   0xb   :  { %169 = vmatpush.bf16.msra.mxu1 %v263_v5 }
   0xe   :  { %157 = vmatpush.bf16.msra.mxu0 %v254_v6 }
   0xf   :  { %170 = vmatpush.bf16.msra.mxu1 %v262_v7 }
  0x12   :  { %158 = vmatpush.bf16.msra.mxu0 %v253_v8 }
  0x13   :  { %171 = vmatpush.bf16.msra.mxu1 %v261_v9 }
  0x16   :  { %159 = vmatpush.bf16.msra.mxu0 %v252_v10 }
  0x17   :  { %172 = vmatpush.bf16.msra.mxu1 %v260_v11 }
  0x1a   :  { %160 = vmatpush.bf16.msra.mxu0 %v251_v12 }
  0x1b   :  { %173 = vmatpush.bf16.msra.mxu1 %v259_v13 }
  0x1e   :  { %161 = vmatpush.bf16.msra.mxu0 %v250_v17 }
  0x1f   :  { %174 = vmatpush.bf16.msra.mxu1 %v258_v18 }
  0x21   :  { %162 = vmatmul.bf16.vlgmr.msra.gmra.mxu0 %v54_v19 }
  0x22   :  { %175 = vmatmul.bf16.vlgmr.msra.gmra.mxu1 %v55_v20 }
  0x9e   :  { %v163_v22 = vpop.f32.mrf.mxu0 }
  0x9f   :  { %v176_v23 = vpop.f32.mrf.mxu1  ;;  %v164_v24 = vadd.f32 %v266_v21, %v163_v22 }
  0xa1   :  { %v177_v25 = vadd.f32 %v176_v23, %v164_v24 }
  0xa3   :  { %181 = vst.msk [vmem:[%s347_s3] sm:$0xff] %vm180_vm0, %v177_v25 }
  0xa6   :  { %v165_v26 = vpop.f32.mrf.mxu0 }
  0xa7   :  { %v178_v27 = vpop.f32.mrf.mxu1 }

// kernel: vit_forward.3
= control target key start
LH: loop header
LB: loop body
LE: loop exit
PB: predicated region body
PF: predicated region fallthrough
CT: control target
= control target key end

     0   :  { %s4931_s0 = inlined_call_operand.vmem [shape: f32[16,32], index: 0, kind: input, shape index: {}]   ;;  %s4932_s1 = inlined_call_operand.vmem [shape: bf16[2,4,32,8], index: 1, kind: input, shape index: {}]   ;;  %s4933_s2 = inlined_call_operand.vmem [shape: f32[2,4,1,8], index: 2, kind: input, shape index: {}]   ;;  %s4934_s3 = inlined_call_operand.vmem [shape: bf16[2,4,32,8], index: 3, kind: input, shape index: {}]   ;;  %s4935_s4 = inlined_call_operand.vmem [shape: f32[2,4,1,8], index: 4, kind: input, shape index: {}]   ;;  %s4936_s5 = inlined_call_operand.vmem [shape: bf16[2,4,32,8], index: 5, kind: input, shape index: {}]   ;;  %s4937_s6 = inlined_call_operand.vmem [shape: f32[2,4,1,8], index: 6, kind: input, shape index: {}]   ;;  %s4938_s7 = inlined_call_operand.vmem [shape: bf16[2,4,8,32], index: 7, kind: input, shape index: {}]   ;;  %s4939_s8 = inlined_call_operand.vmem [shape: f32[2,1,32], index: 8, kind: input, shape index: {}]   ;;  %s4940_s9 = inlined_call_operand.vmem [shape: f32[2,1,32], index: 9, kind: input, shape index: {}]   ;;  %s4941_s10 = inlined_call_operand.vmem [shape: f32[2,1,32], index: 10, kind: input, shape index: {}]   ;;  %s4942_s11 = inlined_call_operand.vmem [shape: bf16[2,32,64], index: 11, kind: input, shape index: {}]   ;;  %s4943_s12 = inlined_call_operand.vmem [shape: f32[2,1,64], index: 12, kind: input, shape index: {}]   ;;  %s4944_s13 = inlined_call_operand.vmem [shape: bf16[2,64,32], index: 13, kind: input, shape index: {}]   ;;  %s4945_s14 = inlined_call_operand.vmem [shape: f32[2,1,32], index: 14, kind: input, shape index: {}]   ;;  %s4946_s15 = inlined_call_operand.vmem [shape: f32[2,1,32], index: 15, kind: input, shape index: {}]   ;;  %s4947_s16 = inlined_call_operand.vmem [shape: f32[2,1,32], index: 16, kind: input, shape index: {}]   ;;  %s4948_s17 = inlined_call_operand.vmem [shape: bf16[32,512], index: 17, kind: input, shape index: {}]   ;;  %s4949_s18 = inlined_call_operand.vmem [shape: f32[1,512], index: 18, kind: input, shape index: {}]   ;;  %s4950_s19 = inlined_call_operand.vmem [shape: bf16[512,256], index: 19, kind: input, shape index: {}]   ;;  %s4951_s20 = inlined_call_operand.vmem [shape: f32[1,256], index: 20, kind: input, shape index: {}]   ;;  %s4952_s21 = inlined_call_operand.vmem [shape: bf16[256,128], index: 21, kind: input, shape index: {}]   ;;  %s4953_s22 = inlined_call_operand.vmem [shape: f32[1,128], index: 22, kind: input, shape index: {}]   ;;  %s4954_s23 = inlined_call_operand.hbm [shape: f32[2,128], index: 23, kind: output, shape index: {}]  }
   0x1   :  { %4964 = sst [smem:[#allocation11_spill]] %s4931_s0 }
   0x2   :  { %4965 = sst [smem:[#allocation12_spill]] %s4932_s1 }
   0x3   :  { %4966 = sst [smem:[#allocation13_spill]] %s4933_s2 }
   0x4   :  { %4967 = sst [smem:[#allocation14_spill]] %s4934_s3 }
   0x5   :  { %4968 = sst [smem:[#allocation15_spill]] %s4935_s4 }
   0x6   :  { %4969 = sst [smem:[#allocation16_spill]] %s4936_s5 }
   0x7   :  { %4970 = sst [smem:[#allocation17_spill]] %s4937_s6 }
   0x8   :  { %4971 = sst [smem:[#allocation18_spill]] %s4938_s7 }
   0x9   :  { %4972 = sst [smem:[#allocation19_spill]] %s4948_s17 }
   0xa   :  { %4973 = sst [smem:[#allocation20_spill]] %s4949_s18 }
   0xb   :  { %4974 = sst [smem:[#allocation21_spill]] %s4950_s19 }
   0xc   :  { %4975 = sst [smem:[#allocation22_spill]] %s4951_s20 }
   0xd   :  { %4976 = sst [smem:[#allocation23_spill]] %s4952_s21 }
   0xe   :  { %4977 = sst [smem:[#allocation24_spill]] %s4953_s22 }
   0xf   :  { %4978 = sst [smem:[#allocation25_spill]] %s4954_s23 }
  0x10   :  { %28 = vsyncpa [#allocation4], 0  ;;  %s4096_s4 = smov 0  }
  0x11 LB: > { %4979 = sst [smem:[#allocation6_spill]] %s3971_s4  ;;  %s4102_s30 = sadd.s32 4294967295, %s3971_s4   ;;  %s3971_s4 = sphi %s4096_s4, %s34_s4  }
  0x12   : > { %p3150_p0 = scmp.ge.s32.totalorder %s3971_s4, 1  ;;  %p766_p1 = scmp.lt.s32.totalorder %s3971_s4, 3 }
  0x14   : > { %p767_p2 = pnand %p3150_p0, %p766_p1 }
  0x16   : > { %770 = sbr.rel (%p767_p2) target bundleno = 3409 (0xd51), region = 112 }
  0x1b   : > { %p883_p3 = scmp.lt.s32.totalorder %s4102_s30, 1  ;;  %s4980_s2 = sld [smem:[#allocation12_spill]] }
  0x1c   : > { %s4982_s28 = sld [smem:[#allocation13_spill]]  ;;  %p3166_p4 = scmp.ne.s32.totalorder %s4102_s30, 0 }
  0x1d   : > { %s4108_s24 = scalar_select %p883_p3, %s4102_s30, 1 }
  0x1e   : > { %s4984_s4 = sld [smem:[#allocation14_spill]] }
  0x1f   : > { %s3730_s25 = sshll.u32 %s4108_s24, 6  ;;  %s3153_s5 = sshll.u32 %s4108_s24, 2 }
  0x20   : > { %s4986_s21 = sld [smem:[#allocation15_spill]]  ;;  %s931_s0 = scalar_lea.vmem %s4943_s12, %s4108_s24 }
  0x21   : > { %s4115_s6 = scalar_lea.vmem %s4980_s2, %s3730_s25  ;;  %s4988_s2 = sld [smem:[#allocation16_spill]] }
  0x22   : > { %4981 = sst [smem:[#allocation7_spill]] %s4115_s6  ;;  %s4120_s29 = scalar_lea.vmem %s4982_s28, %s3153_s5 }
  0x23   : > { %4983 = sst [smem:[#allocation8_spill]] %s4120_s29  ;;  %s3733_s29 = sshll.u32 %s4108_s24, 4 }
  0x24   : > { %s4125_s23 = scalar_lea.vmem %s4984_s4, %s3730_s25  ;;  %s4989_s28 = sld [smem:[#allocation17_spill]] }
  0x25   : > { %4985 = sst [smem:[#allocation9_spill]] %s4125_s23  ;;  %s4163_s7 = scalar_lea.vmem %s4942_s11, %s3733_s29 }
  0x26   : > { %s4130_s18 = scalar_lea.vmem %s4986_s21, %s3153_s5  ;;  %s4990_s20 = sld [smem:[#allocation18_spill]] }
  0x27   : > { %4987 = sst [smem:[#allocation10_spill]] %s4130_s18  ;;  %s4135_s19 = scalar_lea.vmem %s4988_s2, %s3730_s25 }
  0x28   : > { %s3735_s23 = sshll.u32 %s4108_s24, 5  ;;  %s939_s1 = scalar_lea.vmem %s4945_s14, %s4108_s24 }
  0x29   : > { %s4173_s4 = scalar_lea.vmem %s4944_s13, %s3735_s23  ;;  %s945_s25 = scalar_lea.vmem %s4947_s16, %s4108_s24 }
  0x2a   : > { %s4140_s17 = scalar_lea.vmem %s4989_s28, %s3153_s5  ;;  %s942_s5 = scalar_lea.vmem %s4946_s15, %s4108_s24 }
  0x2b   : > { %950 = sbr.rel (%p3166_p4) target bundleno = 52 (0x34), region = 116  ;;  %s4991_s6 = sld [smem:[#allocation11_spill]] (!%p3166_p4) }
  0x2c   : > { %s4150_s21 = scalar_lea.vmem %s4990_s20, %s3733_s29 }
  0x30   : > { %vm953_vm0 = vcmask 261120  }
  0x31   : > { %v951_v0 = vld [vmem:[%s4991_s6] sm:$0xff]  ;;  %v952_v1 = vld [vmem:[%s4991_s6 + $0x8] sm:$0xff] }
  0x32   : > { %954 = vst.msk [vmem:[#allocation2] sm:$0xff] %vm953_vm0, %v951_v0 }
  0x33   : > { %955 = vst.msk [vmem:[#allocation2 + $0x8] sm:$0xff] %vm953_vm0, %v952_v1 }
  0x34 PF: > { %s4992_s2 = sld [smem:[#allocation7_spill]]  ;;  %vm983_vm1 = vcmask 261120   ;;  %vm1073_vm2 = vcmask 64512   ;;  %v959_v29 = vlaneseq  ;;  %v3973_v31 = vmov -1e+30   ;;  %v3741_v39 = vld [vmem:[%s4135_s19 + $0x8] sm:$0xff]  ;;  %s4996_s29 = scalar_lea.vmem %s4939_s8, %s4108_s24 }
  0x35   : > { %s4993_s18 = sld [smem:[#allocation9_spill]]  ;;  %1061 = vmatpush.bf16.msra.mxu2 %v3741_v39  ;;  %v3740_v41 = vld [vmem:[%s4135_s19] sm:$0xff]  ;;  %vm1141_vm4 = vcmask 1043456   ;;  %s4997_s27 = scalar_lea.vmem %s4940_s9, %s4108_s24  ;;  %vm2066_vm12 = vcmask 523264  }
  0x36   : > { %s4994_s22 = sld [smem:[#allocation10_spill]]  ;;  %v960_v30 = vand.u32 127, %v959_v29  ;;  %s4998_s23 = scalar_lea.vmem %s4941_s10, %s4108_s24 }
  0x37   : > { %s4995_s26 = sld [smem:[#allocation8_spill]]  ;;  %p3369_p5 = scmp.ne.s32.totalorder %s4102_s30, 1 }
  0x38   : > { %vm961_vm3 = vcmp.lt.s32.totalorder %v960_v30, 5 }
  0x39   : > { %v4198_v6 = vld [vmem:[#allocation2] sm:$0xff]  ;;  %v4224_v32 = vsel %vm961_vm3, 0.0, %v3973_v31  ;;  %1062 = vmatpush.bf16.msra.mxu2 %v3740_v41 }
  0x3a   : > { %v3737_v2 = vld [vmem:[%s4992_s2 + $0x8] sm:$0xff]  ;;  %v3736_v4 = vld [vmem:[%s4992_s2] sm:$0xff]  ;;  %v3743_v15 = vld [vmem:[%s4992_s2 + $0x18] sm:$0xff] }
  0x3b   : > { %v3739_v3 = vld [vmem:[%s4993_s18 + $0x8] sm:$0xff]  ;;  %v3738_v5 = vld [vmem:[%s4993_s18] sm:$0xff]  ;;  %993 = vmatpush.bf16.msra.mxu0 %v3737_v2  ;;  %v3742_v18 = vld [vmem:[%s4992_s2 + $0x10] sm:$0xff] }
  0x3c   : > { %1027 = vmatpush.bf16.msra.mxu1 %v3739_v3  ;;  %v4200_v7 = vld [vmem:[#allocation2 + $0x8] sm:$0xff]  ;;  %v3872_v9 = vld [vmem:[%s4994_s22] ss:$0 sm:$0xff]  ;;  %v3745_v23 = vld [vmem:[%s4993_s18 + $0x18] sm:$0xff] }
  0x3d   : > { %v4204_v8 = vpack.c.bf16 %v4200_v7, %v4198_v6  ;;  %v3871_v11 = vld [vmem:[%s4995_s26] ss:$0 sm:$0xff]  ;;  %v3744_v27 = vld [vmem:[%s4993_s18 + $0x10] sm:$0xff]  ;;  %v3874_v43 = vld [vmem:[%s4995_s26 + $0x1] ss:$0 sm:$0xff] }
  0x3e   : > { %v3873_v45 = vld [vmem:[%s4994_s22 + $0x1] ss:$0 sm:$0xff]  ;;  %v3875_v2 = vld [vmem:[%s4140_s17] ss:$0 sm:$0xff] }
  0x3f   : > { %994 = vmatpush.bf16.msra.mxu0 %v3736_v4  ;;  %3193 = vmatmul.msk.bf16.vlgmr.msra.gmra.mxu2 %vm983_vm1, %v4204_v8 }
  0x40   : > { %1028 = vmatpush.bf16.msra.mxu1 %v3738_v5 }
  0x42   : > { %3175 = vmatmul.msk.bf16.vlgmr.msra.gmra.mxu0 %vm983_vm1, %v4204_v8 }
  0x43   : > { %3184 = vmatmul.msk.bf16.vlgmr.msra.gmra.mxu1 %vm983_vm1, %v4204_v8 }
  0xbf   : > { %v996_v13 = vpop.f32.mrf.mxu0 }
  0xc0   : > { %v1030_v10 = vpop.f32.mrf.mxu1  ;;  %v997_v16 = vadd.f32 %v3871_v11, %v996_v13 }
  0xc1   : > { %v1031_v12 = vadd.f32 %v3872_v9, %v1030_v10 }
  0xc2   : > { %v1069_v20 = vpack.c.bf16 %v997_v16, %v997_v16  ;;  %v1064_v3 = vpop.f32.mrf.mxu2 }
  0xc3   : > { %v1071_v14 = vpack.c.bf16 %v1031_v12, %v1031_v12  ;;  %v1065_v4 = vadd.f32 %v3875_v2, %v1064_v3 }
  0xc5   : > { %v1078_v17 = vsel %vm1073_vm2, %v1071_v14, 0  ;;  %v1136_v5 = vpack.c.bf16 %v1065_v4, %v1065_v4  ;;  %v3751_v4 = vld [vmem:[%s4993_s18 + $0x28] sm:$0xff] }
  0xc6   : > { %1087 = vmatpush.bf16.xpose.msra.mxu3 %v1078_v17 }
  0xc7   : > { %v998_v24 = vpop.f32.mrf.mxu0 }
  0xc8   : > { %v1032_v19 = vpop.f32.mrf.mxu1  ;;  %v999_v26 = vadd.f32 %v3871_v11, %v998_v24 }
  0xc9   : > { %v1033_v21 = vadd.f32 %v3872_v9, %v1032_v19  ;;  %v1143_v9 = vsel %vm1141_vm4, %v1136_v5, 0  ;;  %v3750_v5 = vld [vmem:[%s4993_s18 + $0x20] sm:$0xff] }
  0xca   : > { %v1070_v28 = vpack.c.bf16 %v999_v26, %v999_v26  ;;  %1152 = vmatpush.bf16.msrb.mxu1 %v1143_v9  ;;  %v1066_v11 = vpop.f32.mrf.mxu2  ;;  %v3749_v9 = vld [vmem:[%s4992_s2 + $0x28] sm:$0xff] }
  0xcb   : > { %v1072_v22 = vpack.c.bf16 %v1033_v21, %v1033_v21  ;;  %v1067_v12 = vadd.f32 %v3875_v2, %v1066_v11 }
  0xcd   : > { %3194 = vmatmul.msk.bf16.vlgmr.msra.gmra.mxu3 %vm1073_vm2, %v1069_v20  ;;  %v1097_v25 = vsel %vm1073_vm2, %v1072_v22, 0  ;;  %v1137_v13 = vpack.c.bf16 %v1067_v12, %v1067_v12  ;;  %v3747_v20 = vld [vmem:[%s4135_s19 + $0x18] sm:$0xff]  ;;  %v3746_v22 = vld [vmem:[%s4135_s19 + $0x10] sm:$0xff] }
  0xce   : > { %1207 = vmatpush.bf16.msrb.mxu3 %v3743_v15  ;;  %1106 = vmatpush.bf16.xpose.msrb.mxu0 %v1097_v25 }
  0xcf   : > { %v1162_v15 = vsel %vm1141_vm4, %v1137_v13, 0  ;;  %1279 = vmatpush.bf16.msra.mxu1 %v3747_v20 }
  0xd0   : > { %1171 = vmatpush.bf16.msrb.mxu2 %v1162_v15  ;;  %v3244_v15 = vld [vmem:[%s4150_s21 + $0x4] sm:$0xf] }
  0xd2   : > { %1208 = vmatpush.bf16.msrb.mxu3 %v3742_v18 }
  0xd3   : > { %1280 = vmatpush.bf16.msra.mxu1 %v3746_v22 }
  0xd5   : > { %3195 = vmatmul.msk.bf16.vlgmr.msrb.gmra.mxu0 %vm1073_vm2, %v1070_v28 }
  0xd6   : > { %1243 = vmatpush.bf16.msra.mxu0 %v3745_v23 }
  0xda   : > { %1244 = vmatpush.bf16.msra.mxu0 %v3744_v27 }
  0xdd   : > { %3211 = vmatmul.msk.bf16.vlgmr.msrb.gmra.mxu3 %vm983_vm1, %v4204_v8 }
  0xe5   : > { %3225 = vmatmul.msk.bf16.vlgmr.msra.gmra.mxu0 %vm983_vm1, %v4204_v8 }
 0x150   : > { %v1089_v33 = vpop.f32.mrf.mxu3 }
 0x151   : > { %v1090_v34 = vadd.f32 %v1089_v33, %v4224_v32 }
 0x152   : > { %v1108_v35 = vpop.f32.mrf.mxu0 }
 0x153   : > { %v1109_v36 = vadd.f32 %v1108_v35, %v4224_v32  ;;  %v1112_v37 = vsel %vm1073_vm2, %v1090_v34, -inf }
 0x154   : > { %1113 = vmax.xlane.f32.xlu1 %v1112_v37  ;;  %v1178_v37 = vld [vmem:[%s4150_s21] sm:$0xf] }
 0x155   : > { %v1115_v38 = vsel %vm1073_vm2, %v1109_v36, -inf }
 0x156   : > { %1116 = vmax.xlane.f32.xlu0 %v1115_v38  ;;  %v1420_v38 = vsel %vm1141_vm4, %v1178_v37, 0  ;;  %v3753_v37 = vld [vmem:[%s4135_s19 + $0x28] sm:$0xff] }
 0x158   : > { %v1091_v40 = vpop.f32.mrf.mxu3 }
 0x15a   : > { %v1110_v42 = vpop.f32.mrf.mxu0 }
 0x160   : > { %v1210_v44 = vpop.f32.mrf.mxu3 }
 0x161   : > { %v4236_v46 = vadd.f32 %v3874_v43, %v1210_v44 }
 0x162   : > { %v1246_v47 = vpop.f32.mrf.mxu0 }
 0x163   : > { %v1247_v48 = vadd.f32 %v3873_v45, %v1246_v47  ;;  %v1287_v30 = vpack.c.bf16 %v4236_v46, %v4236_v46 }
 0x165   : > { %v1289_v10 = vpack.c.bf16 %v1247_v48, %v1247_v48 }
 0x167   : > { %v1295_v14 = vsel %vm1073_vm2, %v1289_v10, 0  ;;  %v3748_v10 = vld [vmem:[%s4992_s2 + $0x20] sm:$0xff] }
 0x168   : > { %v1212_v51 = vpop.f32.mrf.mxu3  ;;  %1304 = vmatpush.bf16.xpose.msra.mxu2 %v1295_v14 }
 0x169   : > { %v1213_v54 = vadd.f32 %v3874_v43, %v1212_v51  ;;  %v3876_v43 = vld [vmem:[%s4140_s17 + $0x1] ss:$0 sm:$0xff] }
 0x16a   : > { %v1248_v49 = vpop.f32.mrf.mxu0 }
 0x16b   : > { %v1249_v50 = vadd.f32 %v3873_v45, %v1248_v49  ;;  %v1288_v55 = vpack.c.bf16 %v1213_v54, %v1213_v54 }
 0x16d   : > { %v1290_v52 = vpack.c.bf16 %v1249_v50, %v1249_v50 }
 0x16f   : > { %v1314_v53 = vsel %vm1073_vm2, %v1290_v52, 0 }
 0x170   : > { %1323 = vmatpush.bf16.xpose.msra.mxu3 %v1314_v53 }
 0x177   : > { %3241 = vmatmul.msk.bf16.vlgmr.msra.gmra.mxu3 %vm1073_vm2, %v1288_v55 }
 0x178   : > { %1429 = vmatpush.bf16.msrb.mxu3 %v1420_v38  ;;  %v3752_v38 = vld [vmem:[%s4135_s19 + $0x20] sm:$0xff] }
 0x1c7   : > { %v1114_v56 = vpop.xlane.xlu1 %1113 }
 0x1c8   : > { %v1118_v57 = vsub.f32 %v1090_v34, %v1114_v56 }
 0x1c9   : > { %v1117_v58 = vpop.xlane.xlu0 %1116 }
 0x1ca   : > { %v1120_v59 = vmul.f32 1.442695, %v1118_v57  ;;  %v1119_v60 = vsub.f32 %v1109_v36, %v1117_v58 }
 0x1cc   : > { %3890 = vpow2.f32 %v1120_v59  ;;  %v1122_v61 = vmul.f32 1.442695, %v1119_v60 }
 0x1ce   : > { %3892 = vpow2.f32 %v1122_v61 }
 0x1d2   : > { %v3891_v62 = vpop.eup %3890 }
 0x1d3   : > { %v1124_v63 = vsel %vm1073_vm2, %v3891_v62, 0.0 }
 0x1d4   : > { %v3893_v0 = vpop.eup %3892  ;;  %1125 = vadd.xlane.f32.xlu1 %v1124_v63 }
 0x1d5   : > { %v1127_v1 = vsel %vm1073_vm2, %v3893_v0, 0.0 }
 0x1d6   : > { %1128 = vadd.xlane.f32.xlu0 %v1127_v1 }
 0x1fa   : > { %v1325_v16 = vpop.f32.mrf.mxu3 }
 0x1fb   : > { %v1326_v17 = vadd.f32 %v1325_v16, %v4224_v32  ;;  %v1400_v16 = vsel %vm1141_vm4, %v3244_v15, 0 }
 0x1fd   : > { %v1332_v18 = vsel %vm1073_vm2, %v1326_v17, -inf }
 0x1fe   : > { %1333 = vmax.xlane.f32.xlu2 %v1332_v18  ;;  %v3877_v18 = vld [vmem:[%s4994_s22 + $0x2] ss:$0 sm:$0xff] }
 0x202   : > { %v1327_v19 = vpop.f32.mrf.mxu3 }
 0x247   : > { %v1126_v21 = vpop.xlane.xlu1 %1125 }
 0x248   : > { %3894 = vrcp.f32 %v1126_v21 }
 0x249   : > { %v1129_v23 = vpop.xlane.xlu0 %1128 }
 0x24a   : > { %3896 = vrcp.f32 %v1129_v23 }
 0x24e   : > { %v3895_v24 = vpop.eup %3894 }
 0x24f   : > { %v1132_v25 = vmul.f32 %v3895_v24, %v3891_v62 }
 0x250   : > { %v3897_v26 = vpop.eup %3896 }
 0x251   : > { %v1133_v27 = vmul.f32 %v3897_v26, %v3893_v0  ;;  %v1134_v28 = vpack.c.bf16 %v1132_v25, %v1132_v25 }
 0x253   : > { %3196 = vmatmul.msk.bf16.vlgmr.msrb.gmra.mxu1 %vm1073_vm2, %v1134_v28  ;;  %v1135_v29 = vpack.c.bf16 %v1133_v27, %v1133_v27 }
 0x255   : > { %3197 = vmatmul.msk.bf16.vlgmr.msrb.gmra.mxu2 %vm1073_vm2, %v1135_v29  ;;  %v3878_v29 = vld [vmem:[%s4995_s26 + $0x2] ss:$0 sm:$0xff] }
 0x256   : > { %1409 = vmatpush.bf16.msrb.mxu2 %v1400_v16 }
 0x263   : > { %3239 = vmatmul.msk.bf16.vlgmr.msra.gmra.mxu1 %vm983_vm1, %v4204_v8 }
 0x265   : > { %3240 = vmatmul.msk.bf16.vlgmr.msra.gmra.mxu2 %vm1073_vm2, %v1287_v30 }
 0x266   : > { %1536 = vmatpush.bf16.msra.mxu2 %v3753_v37 }
 0x26a   : > { %1537 = vmatpush.bf16.msra.mxu2 %v3752_v38 }
 0x271   : > { %v1334_v31 = vpop.xlane.xlu2 %1333 }
 0x272   : > { %v1336_v33 = vsub.f32 %v1326_v17, %v1334_v31 }
 0x274   : > { %v1339_v34 = vmul.f32 1.442695, %v1336_v33 }
 0x276   : > { %3898 = vpow2.f32 %v1339_v34 }
 0x27c   : > { %v3899_v35 = vpop.eup %3898 }
 0x27d   : > { %v1344_v36 = vsel %vm1073_vm2, %v3899_v35, 0.0 }
 0x27e   : > { %1345 = vadd.xlane.f32.xlu0 %v1344_v36 }
 0x2d0   : > { %v1154_v39 = vpop.f32.mrf.mxu1 }
 0x2d8   : > { %v1156_v40 = vpop.f32.mrf.mxu1  ;;  %v1173_v41 = vpop.f32.mrf.mxu2 }
 0x2d9   : > { %v1177_v42 = vpack.c.bf16 %v1173_v41, %v1154_v39 }
 0x2db   : > { %3246 = vmatmul.msk.bf16.vlgmr.msrb.gmra.mxu3 %vm1073_vm2, %v1177_v42 }
 0x2e0   : > { %v1175_v44 = vpop.f32.mrf.mxu2  ;;  %v1282_v45 = vpop.f32.mrf.mxu1 }
 0x2e1   : > { %v1283_v46 = vadd.f32 %v3876_v43, %v1282_v45 }
 0x2e3   : > { %v1353_v47 = vpack.c.bf16 %v1283_v46, %v1283_v46 }
 0x2e5   : > { %v1359_v48 = vsel %vm1141_vm4, %v1353_v47, 0 }
 0x2e6   : > { %1368 = vmatpush.bf16.msrb.mxu0 %v1359_v48 }
 0x2e8   : > { %v1306_v49 = vpop.f32.mrf.mxu2  ;;  %v1284_v50 = vpop.f32.mrf.mxu1 }
 0x2e9   : > { %v1307_v51 = vadd.f32 %v1306_v49, %v4224_v32  ;;  %v1285_v52 = vadd.f32 %v3876_v43, %v1284_v50 }
 0x2ea   : > { %1464 = vmatpush.bf16.msra.mxu0 %v3749_v9  ;;  %v3757_v9 = vld [vmem:[%s4993_s18 + $0x38] sm:$0xff] }
 0x2eb   : > { %v1329_v53 = vsel %vm1073_vm2, %v1307_v51, -inf  ;;  %v1354_v54 = vpack.c.bf16 %v1285_v52, %v1285_v52 }
 0x2ec   : > { %1330 = vmax.xlane.f32.xlu2 %v1329_v53 }
 0x2ed   : > { %v1378_v55 = vsel %vm1141_vm4, %v1354_v54, 0 }
 0x2ee   : > { %1387 = vmatpush.bf16.msrb.mxu1 %v1378_v55  ;;  %1465 = vmatpush.bf16.msra.mxu0 %v3748_v10  ;;  %v3756_v10 = vld [vmem:[%s4993_s18 + $0x30] sm:$0xff] }
 0x2f0   : > { %v1308_v56 = vpop.f32.mrf.mxu2 }
 0x2f1   : > { %v1346_v57 = vpop.xlane.xlu0 %1345 }
 0x2f2   : > { %3900 = vrcp.f32 %v1346_v57  ;;  %1500 = vmatpush.bf16.msra.mxu1 %v3751_v4 }
 0x2f6   : > { %1501 = vmatpush.bf16.msra.mxu1 %v3750_v5 }
 0x2f8   : > { %v3901_v58 = vpop.eup %3900 }
 0x2f9   : > { %v1350_v59 = vmul.f32 %v3901_v58, %v3899_v35 }
 0x2fb   : > { %v1352_v60 = vpack.c.bf16 %v1350_v59, %v1350_v59 }
 0x2fd   : > { %3243 = vmatmul.msk.bf16.vlgmr.msrb.gmra.mxu1 %vm1073_vm2, %v1352_v60 }
 0x30d   : > { %3274 = vmatmul.msk.bf16.vlgmr.msra.gmra.mxu1 %vm983_vm1, %v4204_v8 }
 0x35e   : > { %v4288_v39 = vpop.f32.mrf.mxu3 }
 0x35f   : > { %v1331_v61 = vpop.xlane.xlu2 %1330 }
 0x360   : > { %v1335_v62 = vsub.f32 %v1307_v51, %v1331_v61  ;;  %v3879_v51 = vld [vmem:[%s4140_s17 + $0x2] ss:$0 sm:$0xff] }
 0x362   : > { %v1337_v63 = vmul.f32 1.442695, %v1335_v62 }
 0x364   : > { %3902 = vpow2.f32 %v1337_v63 }
 0x366   : > { %v4292_v40 = vpop.f32.mrf.mxu3 }
 0x36a   : > { %v3903_v0 = vpop.eup %3902 }
 0x36b   : > { %v1341_v1 = vsel %vm1073_vm2, %v3903_v0, 0.0 }
 0x36c   : > { %1342 = vadd.xlane.f32.xlu1 %v1341_v1 }
 0x37a   : > { %v1389_v2 = vpop.f32.mrf.mxu1 }
 0x382   : > { %v1391_v3 = vpop.f32.mrf.mxu1 }
 0x38a   : > { %v1503_v17 = vpop.f32.mrf.mxu1 }
 0x38b   : > { %v1504_v19 = vadd.f32 %v3877_v18, %v1503_v17 }
 0x38d   : > { %v1546_v20 = vpack.c.bf16 %v1504_v19, %v1504_v19 }
 0x38f   : > { %v1552_v21 = vsel %vm1073_vm2, %v1546_v20, 0 }
 0x390   : > { %1561 = vmatpush.bf16.xpose.msra.mxu3 %v1552_v21  ;;  %v3293_v21 = vld [vmem:[%s4150_s21 + $0x8] sm:$0xf] }
 0x392   : > { %v1505_v22 = vpop.f32.mrf.mxu1 }
 0x393   : > { %v1506_v23 = vadd.f32 %v3877_v18, %v1505_v22  ;;  %v1657_v22 = vsel %vm1141_vm4, %v3293_v21, 0 }
 0x395   : > { %v1547_v24 = vpack.c.bf16 %v1506_v23, %v1506_v23 }
 0x397   : > { %v1571_v25 = vsel %vm1073_vm2, %v1547_v24, 0 }
 0x398   : > { %1666 = vmatpush.bf16.msrb.mxu3 %v1657_v22 }
 0x3df   : > { %v1343_v11 = vpop.xlane.xlu1 %1342 }
 0x3e0   : > { %3904 = vrcp.f32 %v1343_v11  ;;  %v3755_v11 = vld [vmem:[%s4992_s2 + $0x38] sm:$0xff] }
 0x3e6   : > { %v3905_v12 = vpop.eup %3904 }
 0x3e7   : > { %v1349_v13 = vmul.f32 %v3905_v12, %v3903_v0  ;;  %v3754_v12 = vld [vmem:[%s4992_s2 + $0x30] sm:$0xff] }
 0x3e9   : > { %v1351_v14 = vpack.c.bf16 %v1349_v13, %v1349_v13 }
 0x3eb   : > { %3242 = vmatmul.msk.bf16.vlgmr.msrb.gmra.mxu0 %vm1073_vm2, %v1351_v14 }
 0x3ec   : > { %1580 = vmatpush.bf16.xpose.msrb.mxu0 %v1571_v25 }
 0x3fb   : > { %3260 = vmatmul.msk.bf16.vlgmr.msra.gmra.mxu0 %vm983_vm1, %v4204_v8 }
 0x3fc   : > { %1703 = vmatpush.bf16.msra.mxu0 %v3755_v11 }
 0x400   : > { %1704 = vmatpush.bf16.msra.mxu0 %v3754_v12 }
 0x468   : > { %v1370_v26 = vpop.f32.mrf.mxu0 }
 0x469   : > { %v1393_v27 = vpack.c.bf16 %v1389_v2, %v1370_v26 }
 0x46b   : > { %3245 = vmatmul.msk.bf16.vlgmr.msrb.gmra.mxu2 %vm1073_vm2, %v1393_v27  ;;  %v3880_v27 = vld [vmem:[%s4994_s22 + $0x3] ss:$0 sm:$0xff] }
 0x470   : > { %v1372_v28 = vpop.f32.mrf.mxu0 }
 0x478   : > { %v1467_v30 = vpop.f32.mrf.mxu0 }
 0x479   : > { %v1468_v31 = vadd.f32 %v3878_v29, %v1467_v30 }
 0x47b   : > { %v1544_v33 = vpack.c.bf16 %v1468_v31, %v1468_v31  ;;  %3288 = vmatmul.msk.bf16.vlgmr.msra.gmra.mxu2 %vm983_vm1, %v4204_v8  ;;  %v3881_v31 = vld [vmem:[%s4995_s26 + $0x3] ss:$0 sm:$0xff] }
 0x47d   : > { %3289 = vmatmul.msk.bf16.vlgmr.msra.gmra.mxu3 %vm1073_vm2, %v1544_v33 }
 0x480   : > { %v1469_v34 = vpop.f32.mrf.mxu0 }
 0x481   : > { %v1470_v35 = vadd.f32 %v3878_v29, %v1469_v34 }
 0x483   : > { %v1545_v36 = vpack.c.bf16 %v1470_v35, %v1470_v35 }
 0x485   : > { %3290 = vmatmul.msk.bf16.vlgmr.msrb.gmra.mxu0 %vm1073_vm2, %v1545_v36 }
 0x495   : > { %3308 = vmatmul.msk.bf16.vlgmr.msra.gmra.mxu0 %vm983_vm1, %v4204_v8 }
 0x4ee   : > { %v4298_v49 = vpop.f32.mrf.mxu2 }
 0x4f6   : > { %v4300_v50 = vpop.f32.mrf.mxu2 }
 0x4fe   : > { %v1539_v52 = vpop.f32.mrf.mxu2 }
 0x4ff   : > { %v1540_v54 = vadd.f32 %v3879_v51, %v1539_v52 }
 0x500   : > { %v1563_v41 = vpop.f32.mrf.mxu3 }
 0x501   : > { %v1564_v42 = vadd.f32 %v1563_v41, %v4224_v32  ;;  %v1610_v57 = vpack.c.bf16 %v1540_v54, %v1540_v54  ;;  %v1434_v54 = vadd.f32 %v4292_v40, %v4300_v50 }
 0x502   : > { %v1582_v43 = vpop.f32.mrf.mxu0 }
 0x503   : > { %v1583_v44 = vadd.f32 %v1582_v43, %v4224_v32  ;;  %v1586_v45 = vsel %vm1073_vm2, %v1564_v42, -inf  ;;  %v1616_v60 = vsel %vm1141_vm4, %v1610_v57, 0 }
 0x504   : > { %1587 = vmax.xlane.f32.xlu2 %v1586_v45  ;;  %1625 = vmatpush.bf16.msrb.mxu1 %v1616_v60 }
 0x505   : > { %v1589_v46 = vsel %vm1073_vm2, %v1583_v44, -inf }
 0x506   : > { %1590 = vmax.xlane.f32.xlu0 %v1589_v46  ;;  %v1541_v62 = vpop.f32.mrf.mxu2 }
 0x507   : > { %v1542_v63 = vadd.f32 %v3879_v51, %v1541_v62  ;;  %v1432_v51 = vadd.f32 %v4288_v39, %v4298_v49  ;;  %v3882_v62 = vld [vmem:[%s4140_s17 + $0x3] ss:$0 sm:$0xff]  ;;  %s5002_s17 = sld [smem:[#allocation20_spill]] (!%p3369_p5) }
 0x508   : > { %v1565_v47 = vpop.f32.mrf.mxu3  ;;  %1739 = vmatpush.bf16.msra.mxu1 %v3757_v9 }
 0x509   : > { %v1611_v0 = vpack.c.bf16 %v1542_v63, %v1542_v63  ;;  %v3759_v47 = vld [vmem:[%s4135_s19 + $0x38] sm:$0xff] }
 0x50a   : > { %v1584_v48 = vpop.f32.mrf.mxu0 }
 0x50b   : > { %v1635_v3 = vsel %vm1141_vm4, %v1611_v0, 0  ;;  %v3758_v48 = vld [vmem:[%s4135_s19 + $0x30] sm:$0xff] }
 0x50c   : > { %1644 = vmatpush.bf16.msrb.mxu2 %v1635_v3  ;;  %1740 = vmatpush.bf16.msra.mxu1 %v3756_v10 }
 0x510   : > { %1775 = vmatpush.bf16.msra.mxu2 %v3759_v47 }
 0x512   : > { %v1706_v33 = vpop.f32.mrf.mxu0 }
 0x513   : > { %v1707_v36 = vadd.f32 %v3881_v31, %v1706_v33  ;;  %v3883_v33 = vld [vmem:[%s4996_s29] ss:$0 sm:$0xff] }
 0x514   : > { %1776 = vmatpush.bf16.msra.mxu2 %v3758_v48 }
 0x515   : > { %v1783_v38 = vpack.c.bf16 %v1707_v36, %v1707_v36 }
 0x51a   : > { %v1708_v43 = vpop.f32.mrf.mxu0 }
 0x51b   : > { %v1709_v45 = vadd.f32 %v3881_v31, %v1708_v43 }
 0x51d   : > { %v1784_v46 = vpack.c.bf16 %v1709_v45, %v1709_v45 }
 0x577   : > { %v1588_v53 = vpop.xlane.xlu2 %1587 }
 0x578   : > { %v1592_v55 = vsub.f32 %v1564_v42, %v1588_v53 }
 0x579   : > { %v1591_v56 = vpop.xlane.xlu0 %1590 }
 0x57a   : > { %v1594_v58 = vmul.f32 1.442695, %v1592_v55  ;;  %v1593_v59 = vsub.f32 %v1583_v44, %v1591_v56 }
 0x57c   : > { %3906 = vpow2.f32 %v1594_v58  ;;  %v1596_v61 = vmul.f32 1.442695, %v1593_v59 }
 0x57e   : > { %3908 = vpow2.f32 %v1596_v61 }
 0x582   : > { %v3907_v1 = vpop.eup %3906 }
 0x583   : > { %v1598_v2 = vsel %vm1073_vm2, %v3907_v1, 0.0 }
 0x584   : > { %v3909_v4 = vpop.eup %3908  ;;  %1599 = vadd.xlane.f32.xlu1 %v1598_v2 }
 0x585   : > { %v1601_v5 = vsel %vm1073_vm2, %v3909_v4, 0.0 }
 0x586   : > { %1602 = vadd.xlane.f32.xlu2 %v1601_v5 }
 0x5f7   : > { %v1600_v13 = vpop.xlane.xlu1 %1599 }
 0x5f8   : > { %3910 = vrcp.f32 %v1600_v13 }
 0x5f9   : > { %v1603_v14 = vpop.xlane.xlu2 %1602 }
 0x5fa   : > { %3912 = vrcp.f32 %v1603_v14 }
 0x5fe   : > { %v3911_v15 = vpop.eup %3910 }
 0x5ff   : > { %v1606_v16 = vmul.f32 %v3911_v15, %v3907_v1 }
 0x600   : > { %v3913_v17 = vpop.eup %3912 }
 0x601   : > { %v1608_v18 = vpack.c.bf16 %v1606_v16, %v1606_v16  ;;  %v1607_v19 = vmul.f32 %v3913_v17, %v3909_v4 }
 0x603   : > { %v1609_v20 = vpack.c.bf16 %v1607_v19, %v1607_v19  ;;  %3291 = vmatmul.msk.bf16.vlgmr.msrb.gmra.mxu1 %vm1073_vm2, %v1608_v18 }
 0x605   : > { %3292 = vmatmul.msk.bf16.vlgmr.msrb.gmra.mxu2 %vm1073_vm2, %v1609_v20 }
 0x613   : > { %3322 = vmatmul.msk.bf16.vlgmr.msra.gmra.mxu1 %vm983_vm1, %v4204_v8 }
 0x615   : > { %3336 = vmatmul.msk.bf16.vlgmr.msra.gmra.mxu2 %vm983_vm1, %v4204_v8 }
 0x680   : > { %v1627_v23 = vpop.f32.mrf.mxu1 }
 0x688   : > { %v1629_v24 = vpop.f32.mrf.mxu1  ;;  %v1646_v25 = vpop.f32.mrf.mxu2 }
 0x689   : > { %v1650_v26 = vpack.c.bf16 %v1646_v25, %v1627_v23  ;;  %v3341_v25 = vld [vmem:[%s4150_s21 + $0xc] sm:$0xf]  ;;  %s5003_s21 = sld [smem:[#allocation23_spill]] (!%p3369_p5) }
 0x68b   : > { %3294 = vmatmul.msk.bf16.vlgmr.msrb.gmra.mxu3 %vm1073_vm2, %v1650_v26  ;;  %v1896_v26 = vsel %vm1141_vm4, %v3341_v25, 0 }
 0x690   : > { %v1648_v28 = vpop.f32.mrf.mxu2  ;;  %v1742_v29 = vpop.f32.mrf.mxu1 }
 0x691   : > { %v1743_v30 = vadd.f32 %v3880_v27, %v1742_v29 }
 0x693   : > { %v1785_v34 = vpack.c.bf16 %v1743_v30, %v1743_v30 }
 0x695   : > { %v1791_v35 = vsel %vm1073_vm2, %v1785_v34, 0 }
 0x696   : > { %1800 = vmatpush.bf16.xpose.msra.mxu3 %v1791_v35 }
 0x698   : > { %v1744_v37 = vpop.f32.mrf.mxu1  ;;  %v1778_v63 = vpop.f32.mrf.mxu2 }
 0x699   : > { %v1745_v41 = vadd.f32 %v3880_v27, %v1744_v37  ;;  %v1779_v50 = vadd.f32 %v3882_v62, %v1778_v63 }
 0x69b   : > { %v1786_v42 = vpack.c.bf16 %v1745_v41, %v1745_v41  ;;  %v1849_v2 = vpack.c.bf16 %v1779_v50, %v1779_v50 }
 0x69d   : > { %v1810_v44 = vsel %vm1073_vm2, %v1786_v42, 0  ;;  %3337 = vmatmul.msk.bf16.vlgmr.msra.gmra.mxu3 %vm1073_vm2, %v1783_v38  ;;  %v1855_v5 = vsel %vm1141_vm4, %v1849_v2, 0 }
 0x69e   : > { %1819 = vmatpush.bf16.xpose.msrb.mxu0 %v1810_v44  ;;  %1864 = vmatpush.bf16.msrb.mxu1 %v1855_v5 }
 0x69f   : > { %1905 = vmatpush.bf16.msrb.mxu3 %v1896_v26  ;;  %v3885_v26 = vld [vmem:[%s4998_s23] ss:$0 sm:$0xff] }
 0x6a0   : > { %v1780_v9 = vpop.f32.mrf.mxu2 }
 0x6a1   : > { %v1781_v10 = vadd.f32 %v3882_v62, %v1780_v9 }
 0x6a3   : > { %v1850_v11 = vpack.c.bf16 %v1781_v10, %v1781_v10 }
 0x6a5   : > { %3338 = vmatmul.msk.bf16.vlgmr.msrb.gmra.mxu0 %vm1073_vm2, %v1784_v46  ;;  %v1874_v14 = vsel %vm1141_vm4, %v1850_v11, 0 }
 0x6a6   : > { %1883 = vmatpush.bf16.msrb.mxu2 %v1874_v14 }
 0x70e   : > { %v1668_v52 = vpop.f32.mrf.mxu3 }
 0x70f   : > { %v4330_v53 = vadd.f32 %v1668_v52, %v1432_v51  ;;  %v3974_v51 = vmov 32.0  }
 0x716   : > { %v1670_v55 = vpop.f32.mrf.mxu3 }
 0x717   : > { %v4336_v56 = vadd.f32 %v1670_v55, %v1434_v54 }
 0x720   : > { %v1802_v57 = vpop.f32.mrf.mxu3 }
 0x721   : > { %v1803_v58 = vadd.f32 %v1802_v57, %v4224_v32 }
 0x722   : > { %v1821_v59 = vpop.f32.mrf.mxu0 }
 0x723   : > { %v1822_v39 = vadd.f32 %v1821_v59, %v4224_v32  ;;  %v1825_v49 = vsel %vm1073_vm2, %v1803_v58, -inf }
 0x724   : > { %1826 = vmax.xlane.f32.xlu1 %v1825_v49 }
 0x725   : > { %v1828_v60 = vsel %vm1073_vm2, %v1822_v39, -inf }
 0x726   : > { %1829 = vmax.xlane.f32.xlu0 %v1828_v60 }
 0x728   : > { %v1804_v61 = vpop.f32.mrf.mxu3 }
 0x72a   : > { %v1823_v8 = vpop.f32.mrf.mxu0 }
 0x72b   : > { %v3760_v8 = vld [vmem:[%s4163_s7] sm:$0xff] }
 0x797   : > { %v1827_v40 = vpop.xlane.xlu1 %1826 }
 0x798   : > { %v1831_v0 = vsub.f32 %v1803_v58, %v1827_v40 }
 0x799   : > { %v1830_v1 = vpop.xlane.xlu0 %1829 }
 0x79a   : > { %v1833_v3 = vmul.f32 1.442695, %v1831_v0  ;;  %v1832_v4 = vsub.f32 %v1822_v39, %v1830_v1  ;;  %v3761_v39 = vld [vmem:[%s4163_s7 + $0x8] sm:$0xff] }
 0x79b   : > { %2019 = vmatpush.bf16.msra.mxu0 %v3761_v39 }
 0x79c   : > { %3914 = vpow2.f32 %v1833_v3  ;;  %v1835_v32 = vmul.f32 1.442695, %v1832_v4 }
 0x79e   : > { %3916 = vpow2.f32 %v1835_v32 }
 0x79f   : > { %2020 = vmatpush.bf16.msra.mxu0 %v3760_v8 }
 0x7a2   : > { %v3915_v12 = vpop.eup %3914 }
 0x7a3   : > { %v1837_v13 = vsel %vm1073_vm2, %v3915_v12, 0.0 }
 0x7a4   : > { %v3917_v15 = vpop.eup %3916  ;;  %1838 = vadd.xlane.f32.xlu0 %v1837_v13 }
 0x7a5   : > { %v1840_v16 = vsel %vm1073_vm2, %v3917_v15, 0.0 }
 0x7a6   : > { %1841 = vadd.xlane.f32.xlu2 %v1840_v16 }
 0x817   : > { %v1839_v17 = vpop.xlane.xlu0 %1838 }
 0x818   : > { %3918 = vrcp.f32 %v1839_v17 }
 0x819   : > { %v1842_v18 = vpop.xlane.xlu2 %1841 }
 0x81a   : > { %3920 = vrcp.f32 %v1842_v18 }
 0x81b   : > { %3922 = vrcp.f32 %v3974_v51 }
 0x81e   : > { %v3919_v19 = vpop.eup %3918 }
 0x81f   : > { %v1845_v20 = vmul.f32 %v3919_v19, %v3915_v12  ;;  %v3884_v19 = vld [vmem:[%s4997_s27] ss:$0 sm:$0xff]  ;;  %s5005_s27 = sld [smem:[#allocation24_spill]] (!%p3369_p5) }
 0x820   : > { %v3921_v21 = vpop.eup %3920 }
 0x821   : > { %v1847_v22 = vpack.c.bf16 %v1845_v20, %v1845_v20  ;;  %v1846_v23 = vmul.f32 %v3921_v21, %v3917_v15  ;;  %v3923_v52 = vpop.eup %3922 }
 0x822   : > { %vm1933_vm5 = vweird.f32 %v3923_v52 }
 0x823   : > { %v1848_v24 = vpack.c.bf16 %v1846_v23, %v1846_v23  ;;  %3339 = vmatmul.msk.bf16.vlgmr.msrb.gmra.mxu1 %vm1073_vm2, %v1847_v22 }
 0x825   : > { %3340 = vmatmul.msk.bf16.vlgmr.msrb.gmra.mxu2 %vm1073_vm2, %v1848_v24 }
 0x8a0   : > { %v1866_v27 = vpop.f32.mrf.mxu1 }
 0x8a8   : > { %v1868_v28 = vpop.f32.mrf.mxu1  ;;  %v1885_v29 = vpop.f32.mrf.mxu2 }
 0x8a9   : > { %v1889_v30 = vpack.c.bf16 %v1885_v29, %v1866_v27 }
 0x8ab   : > { %3342 = vmatmul.msk.bf16.vlgmr.msrb.gmra.mxu3 %vm1073_vm2, %v1889_v30 }
 0x8b0   : > { %v1887_v31 = vpop.f32.mrf.mxu2 }
 0x8b1   : > { %v3765_v31 = vld [vmem:[%s4173_s4 + $0x18] sm:$0xff] }
 0x8b2   : > { %2074 = vmatpush.bf16.msra.mxu1 %v3765_v31 }
 0x92e   : > { %v1907_v34 = vpop.f32.mrf.mxu3 }
 0x92f   : > { %v1912_v35 = vadd.f32 %v1907_v34, %v4330_v53  ;;  %v1929_v53 = vmul.f32 32.0, %v3923_v52  ;;  %v3763_v34 = vld [vmem:[%s4173_s4 + $0x8] sm:$0xff] }
 0x931   : > { %v1918_v36 = vadd.f32 %v3883_v33, %v1912_v35  ;;  %v1930_v54 = vsub.f32 1.0, %v1929_v53  ;;  %v3762_v35 = vld [vmem:[%s4173_s4] sm:$0xff] }
 0x933   : > { %v4359_v37 = vadd.f32 %v1918_v36, %v4198_v6  ;;  %v1931_v55 = vmul.f32 %v3923_v52, %v1930_v54 }
 0x935   : > { %v1922_v38 = vsel %vm983_vm1, %v4359_v37, 0.0  ;;  %v1937_v41 = vmul.f32 %v4359_v37, %v4359_v37 }
 0x936   : > { %1923 = vadd.xlane.f32.xlu1 %v1922_v38  ;;  %v1909_v42 = vpop.f32.mrf.mxu3 }
 0x937   : > { %v1913_v43 = vadd.f32 %v1909_v42, %v4336_v56  ;;  %v1939_v44 = vsel %vm983_vm1, %v1937_v41, 0.0  ;;  %v1932_v56 = vadd.f32 %v3923_v52, %v1931_v55 }
 0x938   : > { %1940 = vadd.xlane.f32.xlu0 %v1939_v44 }
 0x939   : > { %v1919_v45 = vadd.f32 %v3883_v33, %v1913_v43  ;;  %v4370_v57 = vsel %vm1933_vm5, %v3923_v52, %v1932_v56  ;;  %v3764_v33 = vld [vmem:[%s4173_s4 + $0x10] sm:$0xff]  ;;  %s5000_s4 = sld [smem:[#allocation21_spill]] (!%p3369_p5) }
 0x93a   : > { %2075 = vmatpush.bf16.msra.mxu1 %v3764_v33 }
 0x93b   : > { %v1921_v46 = vadd.f32 %v1919_v45, %v4200_v7 }
 0x93d   : > { %v1925_v47 = vsel %vm983_vm1, %v1921_v46, 0.0  ;;  %v1938_v6 = vmul.f32 %v1921_v46, %v1921_v46 }
 0x93e   : > { %1926 = vadd.xlane.f32.xlu2 %v1925_v47  ;;  %2076 = vmatpush.bf16.msra.mxu1 %v3763_v34 }
 0x93f   : > { %v1942_v48 = vsel %vm983_vm1, %v1938_v6, 0.0 }
 0x940   : > { %1943 = vadd.xlane.f32.xlu1 %v1942_v48 }
 0x942   : > { %2077 = vmatpush.bf16.msra.mxu1 %v3762_v35 }
 0x9a9   : > { %v1924_v7 = vpop.xlane.xlu1 %1923 }
 0x9aa   : > { %v1935_v58 = vmul.f32 %v4370_v57, %v1924_v7 }
 0x9ab   : > { %v1941_v59 = vpop.xlane.xlu0 %1940 }
 0x9ac   : > { %v1947_v49 = vmul.f32 %v1935_v58, %v1935_v58  ;;  %v1945_v60 = vmul.f32 %v1941_v59, %v4370_v57  ;;  %v1951_v17 = vsub.f32 %v4359_v37, %v1935_v58  ;;  %v3886_v37 = vld [vmem:[%s931_s0] ss:$0 sm:$0xff]  ;;  %s5001_s0 = smov (!%p3369_p5), %s5000_s4 }
 0x9ae   : > { %v1949_v61 = vsub.f32 %v1945_v60, %v1947_v49 }
 0x9b0   : > { %v1953_v62 = vadd.f32 1e-05, %v1949_v61 }
 0x9b1   : > { %v1927_v63 = vpop.xlane.xlu2 %1926 }
 0x9b2   : > { %3924 = vrsqrt.f32 %v1953_v62  ;;  %v1936_v40 = vmul.f32 %v4370_v57, %v1927_v63  ;;  %vm1961_vm7 = vweird.f32 %v1953_v62 }
 0x9b3   : > { %v1944_v50 = vpop.xlane.xlu1 %1943 }
 0x9b4   : > { %v1948_v0 = vmul.f32 %v1936_v40, %v1936_v40  ;;  %v1946_v1 = vmul.f32 %v1944_v50, %v4370_v57  ;;  %v1952_v22 = vsub.f32 %v1921_v46, %v1936_v40  ;;  %v3887_v46 = vld [vmem:[%s939_s1] ss:$0 sm:$0xff] }
 0x9b6   : > { %v1950_v2 = vsub.f32 %v1946_v1, %v1948_v0 }
 0x9b8   : > { %v3925_v3 = vpop.eup %3924  ;;  %v1954_v4 = vadd.f32 1e-05, %v1950_v2 }
 0x9b9   : > { %v1956_v5 = vmul.f32 %v3925_v3, %v1953_v62  ;;  %vm1962_vm6 = vweird.f32 %v3925_v3 }
 0x9ba   : > { %3926 = vrsqrt.f32 %v1954_v4  ;;  %vm1963_vm8 = vmor %vm1961_vm7, %vm1962_vm6  ;;  %vm1971_vm10 = vweird.f32 %v1954_v4 }
 0x9bb   : > { %v1957_v32 = vmul.f32 %v3925_v3, %v1956_v5 }
 0x9bd   : > { %v1958_v9 = vmul.f32 0.5, %v1957_v32 }
 0x9bf   : > { %v1959_v10 = vsub.f32 1.5, %v1958_v9 }
 0x9c0   : > { %v3927_v11 = vpop.eup %3926 }
 0x9c1   : > { %v1960_v12 = vmul.f32 %v3925_v3, %v1959_v10  ;;  %v1966_v13 = vmul.f32 %v3927_v11, %v1954_v4  ;;  %vm1972_vm9 = vweird.f32 %v3927_v11 }
 0x9c2   : > { %vm1973_vm11 = vmor %vm1971_vm10, %vm1972_vm9 }
 0x9c3   : > { %v1967_v14 = vmul.f32 %v3927_v11, %v1966_v13  ;;  %v1964_v15 = vsel %vm1963_vm8, %v3925_v3, %v1960_v12 }
 0x9c4   : > { %v1975_v20 = vmul.f32 %v1964_v15, %v1951_v17 }
 0x9c5   : > { %v1968_v16 = vmul.f32 0.5, %v1967_v14 }
 0x9c6   : > { %v1981_v24 = vmul.f32 %v3884_v19, %v1975_v20 }
 0x9c7   : > { %v1969_v18 = vsub.f32 1.5, %v1968_v16 }
 0x9c8   : > { %v1987_v28 = vadd.f32 %v3885_v26, %v1981_v24 }
 0x9c9   : > { %v1970_v21 = vmul.f32 %v3927_v11, %v1969_v18  ;;  %v3889_v18 = vld [vmem:[%s945_s25] ss:$0 sm:$0xff]  ;;  %s5004_s25 = sld [smem:[#allocation22_spill]] (!%p3369_p5) }
 0x9cb   : > { %v1974_v23 = vsel %vm1973_vm11, %v3927_v11, %v1970_v21 }
 0x9cc   : > { %v1976_v25 = vmul.f32 %v1974_v23, %v1952_v22 }
 0x9ce   : > { %v1982_v27 = vmul.f32 %v3884_v19, %v1976_v25 }
 0x9d0   : > { %v1988_v29 = vadd.f32 %v3885_v26, %v1982_v27 }
 0x9d2   : > { %v1994_v30 = vpack.c.bf16 %v1988_v29, %v1987_v28 }
 0x9d4   : > { %3351 = vmatmul.msk.bf16.vlgmr.msra.gmra.mxu0 %vm983_vm1, %v1994_v30 }
 0xa51   : > { %v2022_v36 = vpop.f32.mrf.mxu0 }
 0xa52   : > { %v2023_v38 = vadd.f32 %v3886_v37, %v2022_v36 }
 0xa54   : > { %v2027_v43 = vmax.f32 %v2023_v38, 0.0 }
 0xa59   : > { %v2024_v41 = vpop.f32.mrf.mxu0 }
 0xa5a   : > { %v2025_v42 = vadd.f32 %v3886_v37, %v2024_v41 }
 0xa5c   : > { %v2028_v44 = vmax.f32 %v2025_v42, 0.0 }
 0xa5e   : > { %v2038_v45 = vpack.c.bf16 %v2028_v44, %v2027_v43 }
 0xa60   : > { %3368 = vmatmul.msk.bf16.vlgmr.msra.gmra.mxu1 %vm2066_vm12, %v2038_v45 }
 0xadd   : > { %v2079_v47 = vpop.f32.mrf.mxu1 }
 0xade   : > { %v2080_v6 = vadd.f32 %v3887_v46, %v2079_v47 }
 0xae0   : > { %v2084_v48 = vadd.f32 %v2080_v6, %v1987_v28 }
 0xae2   : > { %v2086_v51 = vsel %vm983_vm1, %v2084_v48, 0.0  ;;  %v2094_v52 = vmul.f32 %v2084_v48, %v2084_v48 }
 0xae3   : > { %2087 = vadd.xlane.f32.xlu2 %v2086_v51 }
 0xae4   : > { %v2096_v53 = vsel %vm983_vm1, %v2094_v52, 0.0 }
 0xae5   : > { %v2081_v54 = vpop.f32.mrf.mxu1  ;;  %2097 = vadd.xlane.f32.xlu1 %v2096_v53 }
 0xae6   : > { %v2082_v55 = vadd.f32 %v3887_v46, %v2081_v54 }
 0xae8   : > { %v2085_v56 = vadd.f32 %v2082_v55, %v1988_v29 }
 0xaea   : > { %v2089_v7 = vsel %vm983_vm1, %v2085_v56, 0.0  ;;  %v2095_v58 = vmul.f32 %v2085_v56, %v2085_v56 }
 0xaeb   : > { %2090 = vadd.xlane.f32.xlu0 %v2089_v7 }
 0xaec   : > { %v2099_v59 = vsel %vm983_vm1, %v2095_v58, 0.0 }
 0xaed   : > { %2100 = vadd.xlane.f32.xlu2 %v2099_v59 }
 0xb56   : > { %v2088_v39 = vpop.xlane.xlu2 %2087 }
 0xb57   : > { %v2092_v49 = vmul.f32 %v2088_v39, %v4370_v57 }
 0xb58   : > { %v2098_v60 = vpop.xlane.xlu1 %2097 }
 0xb59   : > { %v2104_v61 = vmul.f32 %v2092_v49, %v2092_v49  ;;  %v2102_v8 = vmul.f32 %v2098_v60, %v4370_v57  ;;  %v2108_v15 = vsub.f32 %v2084_v48, %v2092_v49 }
 0xb5b   : > { %v2106_v62 = vsub.f32 %v2102_v8, %v2104_v61 }
 0xb5d   : > { %v2110_v63 = vadd.f32 1e-05, %v2106_v62 }
 0xb5e   : > { %v2091_v40 = vpop.xlane.xlu0 %2090 }
 0xb5f   : > { %3928 = vrsqrt.f32 %v2110_v63  ;;  %v2093_v50 = vmul.f32 %v2091_v40, %v4370_v57  ;;  %vm2118_vm14 = vweird.f32 %v2110_v63 }
 0xb60   : > { %v2101_v0 = vpop.xlane.xlu2 %2100 }
 0xb61   : > { %v2105_v1 = vmul.f32 %v2093_v50, %v2093_v50  ;;  %v2103_v2 = vmul.f32 %v2101_v0, %v4370_v57  ;;  %v3888_v57 = vld [vmem:[%s942_s5] ss:$0 sm:$0xff]  ;;  %v2109_v25 = vsub.f32 %v2085_v56, %v2093_v50  ;;  %s4999_s5 = sld [smem:[#allocation19_spill]] (!%p3369_p5) }
 0xb63   : > { %v2107_v3 = vsub.f32 %v2103_v2, %v2105_v1 }
 0xb65   : > { %v3929_v4 = vpop.eup %3928  ;;  %v2111_v5 = vadd.f32 1e-05, %v2107_v3 }
 0xb66   : > { %v2113_v32 = vmul.f32 %v3929_v4, %v2110_v63  ;;  %vm2119_vm13 = vweird.f32 %v3929_v4 }
 0xb67   : > { %3930 = vrsqrt.f32 %v2111_v5  ;;  %vm2120_vm15 = vmor %vm2118_vm14, %vm2119_vm13  ;;  %vm2128_vm2 = vweird.f32 %v2111_v5 }
 0xb68   : > { %v2114_v9 = vmul.f32 %v3929_v4, %v2113_v32 }
 0xb6a   : > { %v2115_v10 = vmul.f32 0.5, %v2114_v9 }
 0xb6c   : > { %v2116_v11 = vsub.f32 1.5, %v2115_v10 }
 0xb6d   : > { %v3931_v12 = vpop.eup %3930 }
 0xb6e   : > { %v2117_v13 = vmul.f32 %v3929_v4, %v2116_v11  ;;  %v2123_v14 = vmul.f32 %v3931_v12, %v2111_v5  ;;  %vm2129_vm0 = vweird.f32 %v3931_v12 }
 0xb6f   : > { %vm2130_vm3 = vmor %vm2128_vm2, %vm2129_vm0 }
 0xb70   : > { %v2121_v16 = vsel %vm2120_vm15, %v3929_v4, %v2117_v13  ;;  %v2124_v17 = vmul.f32 %v3931_v12, %v2123_v14 }
 0xb71   : > { %v2132_v19 = vmul.f32 %v2121_v16, %v2108_v15 }
 0xb72   : > { %v2125_v20 = vmul.f32 0.5, %v2124_v17 }
 0xb73   : > { %v2138_v21 = vmul.f32 %v3888_v57, %v2132_v19 }
 0xb74   : > { %v2126_v22 = vsub.f32 1.5, %v2125_v20 }
 0xb75   : > { %v2144_v23 = vadd.f32 %v3889_v18, %v2138_v21 }
 0xb76   : > { %v2127_v24 = vmul.f32 %v3931_v12, %v2126_v22 }
 0xb77   : > { %2146 = vst.msk [vmem:[#allocation2] sm:$0xff] %vm983_vm1, %v2144_v23 }
 0xb78   : > { %v2131_v26 = vsel %vm2130_vm3, %v3931_v12, %v2127_v24 }
 0xb79   : > { %v2133_v27 = vmul.f32 %v2131_v26, %v2109_v25 }
 0xb7b   : > { %v2139_v28 = vmul.f32 %v3888_v57, %v2133_v27  ;;  %2151 = sbr.rel (%p3369_p5) target bundleno = 3398 (0xd46), region = 120 }
 0xb7d   : > { %v2145_v29 = vadd.f32 %v3889_v18, %v2139_v28 }
 0xb7f   : > { %2147 = vst.msk [vmem:[#allocation2 + $0x8] sm:$0xff] %vm983_vm1, %v2145_v29 }
 0xb80   : > { %v3388_v30 = vld [vmem:[%s4999_s5 + $0x20] sm:$0xf]  ;;  %v3772_v31 = vld [vmem:[%s4999_s5 + $0x2c] sm:$0xf0]  ;;  %v3770_v33 = vld [vmem:[%s4999_s5 + $0x24] sm:$0xf]  ;;  %v2161_v34 = vpack.c.bf16 %v2144_v23, %v2144_v23  ;;  %v2162_v35 = vpack.c.bf16 %v2145_v29, %v2145_v29 }
 0xb81   : > { %v3389_v36 = vor.u32 %v3772_v31, %v3388_v30  ;;  %v3390_v37 = vld [vmem:[%s4999_s5 + $0x30] sm:$0xf0]  ;;  %v3372_v38 = vld [vmem:[%s4999_s5] sm:$0xf]  ;;  %v3768_v41 = vld [vmem:[%s4999_s5 + $0xc] sm:$0xf0] }
 0xb82   : > { %v3393_v42 = vor.u32 %v3770_v33, %v3390_v37  ;;  %v3766_v43 = vld [vmem:[%s4999_s5 + $0x4] sm:$0xf]  ;;  %v3374_v44 = vld [vmem:[%s4999_s5 + $0x10] sm:$0xf0]  ;;  %v2174_v45 = vunpack.c.l.b16 %v2161_v34  ;;  %v2175_v46 = vunpack.c.l.b16 %v2162_v35  ;;  %v3396_v47 = vld [vmem:[%s4999_s5 + $0x28] sm:$0xf]  ;;  %v3373_v6 = vor.u32 %v3768_v41, %v3372_v38 }
 0xb83   : > { %2229 = vmatpush.bf16.msra.mxu2 %v3389_v36  ;;  %vm2177_vm4 = vcmask 1041409   ;;  %v3773_v48 = vld [vmem:[%s4999_s5 + $0x34] sm:$0xf0]  ;;  %v3771_v51 = vld [vmem:[%s4999_s5 + $0x2c] sm:$0xf]  ;;  %v3377_v52 = vor.u32 %v3766_v43, %v3374_v44 }
 0xb84   : > { %2242 = vmatpush.bf16.msra.mxu3 %v3393_v42  ;;  %v2176_v53 = vrot.slane %v2175_v46, 7  ;;  %v3397_v54 = vor.u32 %v3773_v48, %v3396_v47  ;;  %v3398_v55 = vld [vmem:[%s4999_s5 + $0x38] sm:$0xf0]  ;;  %v3380_v56 = vld [vmem:[%s4999_s5 + $0x8] sm:$0xf] }
 0xb85   : > { %v3401_v7 = vor.u32 %v3771_v51, %v3398_v55  ;;  %v3769_v58 = vld [vmem:[%s4999_s5 + $0x14] sm:$0xf0]  ;;  %v3767_v59 = vld [vmem:[%s4999_s5 + $0xc] sm:$0xf]  ;;  %v3382_v39 = vld [vmem:[%s4999_s5 + $0x18] sm:$0xf0] }
 0xb86   : > { %v2178_v49 = vsel %vm2177_vm4, %v2176_v53, %v2174_v45  ;;  %v3464_v60 = vld [vmem:[%s5000_s4 + $0x70] sm:$0xf]  ;;  %v3789_v61 = vld [vmem:[%s5001_s0 + $0x74] sm:$0xf0]  ;;  %v3456_v50 = vld [vmem:[%s5001_s0 + $0x60] sm:$0xf]  ;;  %v3381_v1 = vor.u32 %v3769_v58, %v3380_v56  ;;  %v3385_v5 = vor.u32 %v3767_v59, %v3382_v39 }
 0xb87   : > { %v3528_v8 = vld [vmem:[%s5001_s0 + $0xf0] sm:$0xf]  ;;  %2230 = vmatpush.bf16.msra.mxu2 %v3373_v6  ;;  %v4482_v62 = vpack.c.b16 %v2178_v49, %v2178_v49  ;;  %v3465_v63 = vor.u32 %v3789_v61, %v3464_v60  ;;  %v3805_v40 = vld [vmem:[%s5001_s0 + $0xf4] sm:$0xf0]  ;;  %v3787_v0 = vld [vmem:[%s5001_s0 + $0x64] sm:$0xf0] }
 0xb88   : > { %2243 = vmatpush.bf16.msra.mxu3 %v3377_v52  ;;  %v3529_v2 = vor.u32 %v3805_v40, %v3528_v8  ;;  %v3520_v3 = vld [vmem:[%s5001_s0 + $0xe0] sm:$0xf]  ;;  %v3803_v4 = vld [vmem:[%s5001_s0 + $0xe4] sm:$0xf0]  ;;  %v3457_v32 = vor.u32 %v3787_v0, %v3456_v50  ;;  %v3448_v10 = vld [vmem:[%s5001_s0 + $0x50] sm:$0xf] }
 0xb89   : > { %2673 = vmatpush.bf16.msra.mxu0 %v3465_v63  ;;  %v3521_v9 = vor.u32 %v3803_v4, %v3520_v3  ;;  %v3785_v11 = vld [vmem:[%s5001_s0 + $0x54] sm:$0xf0]  ;;  %v3512_v12 = vld [vmem:[%s5001_s0 + $0xd0] sm:$0xf]  ;;  %v3440_v19 = vld [vmem:[%s5001_s0 + $0x40] sm:$0xf] }
 0xb8a   : > { %3402 = vmatmul.msk.bf16.vlgmr.msra.gmra.mxu2 %vm983_vm1, %v4482_v62  ;;  %2686 = vmatpush.bf16.msra.mxu1 %v3529_v2  ;;  %v3801_v13 = vld [vmem:[%s5001_s0 + $0xd4] sm:$0xf0]  ;;  %v3592_v14 = vld [vmem:[%s5001_s0 + $0x170] sm:$0xf]  ;;  %v3449_v15 = vor.u32 %v3785_v11, %v3448_v10  ;;  %v3783_v20 = vld [vmem:[%s5001_s0 + $0x44] sm:$0xf0] }
 0xb8b   : > { %2255 = vmatpush.bf16.msrb.mxu2 %v3397_v54  ;;  %3403 = vmatmul.msk.bf16.vlgmr.msra.gmra.mxu3 %vm983_vm1, %v4482_v62  ;;  %v3821_v57 = vld [vmem:[%s5001_s0 + $0x174] sm:$0xf0]  ;;  %v3656_v16 = vld [vmem:[%s5001_s0 + $0x1f0] sm:$0xf]  ;;  %v3513_v18 = vor.u32 %v3801_v13, %v3512_v12  ;;  %v3504_v21 = vld [vmem:[%s5001_s0 + $0xc0] sm:$0xf]  ;;  %v3441_v30 = vor.u32 %v3783_v20, %v3440_v19 }
 0xb8c   : > { %2268 = vmatpush.bf16.msrb.mxu3 %v3401_v7  ;;  %v3837_v17 = vld [vmem:[%s5001_s0 + $0x1f4] sm:$0xf0]  ;;  %v3593_v22 = vor.u32 %v3821_v57, %v3592_v14  ;;  %v3799_v24 = vld [vmem:[%s5001_s0 + $0xc4] sm:$0xf0]  ;;  %v3584_v25 = vld [vmem:[%s5001_s0 + $0x160] sm:$0xf] }
 0xb8d   : > { %2674 = vmatpush.bf16.msra.mxu0 %v3457_v32  ;;  %v3657_v23 = vor.u32 %v3837_v17, %v3656_v16  ;;  %v3819_v26 = vld [vmem:[%s5001_s0 + $0x164] sm:$0xf0]  ;;  %v3648_v28 = vld [vmem:[%s5001_s0 + $0x1e0] sm:$0xf]  ;;  %v3432_v31 = vld [vmem:[%s5001_s0 + $0x30] sm:$0xf]  ;;  %v3505_v35 = vor.u32 %v3799_v24, %v3504_v21 }
 0xb8e   : > { %2687 = vmatpush.bf16.msra.mxu1 %v3521_v9  ;;  %v3585_v27 = vor.u32 %v3819_v26, %v3584_v25  ;;  %v3835_v29 = vld [vmem:[%s5001_s0 + $0x1e4] sm:$0xf0]  ;;  %v3781_v33 = vld [vmem:[%s5001_s0 + $0x34] sm:$0xf0]  ;;  %v3576_v36 = vld [vmem:[%s5001_s0 + $0x150] sm:$0xf] }
 0xb8f   : > { %2256 = vmatpush.bf16.msrb.mxu2 %v3381_v1  ;;  %v3649_v34 = vor.u32 %v3835_v29, %v3648_v28  ;;  %v3817_v37 = vld [vmem:[%s5001_s0 + $0x154] sm:$0xf0]  ;;  %v3640_v38 = vld [vmem:[%s5001_s0 + $0x1d0] sm:$0xf]  ;;  %v3568_v46 = vld [vmem:[%s5001_s0 + $0x140] sm:$0xf]  ;;  %v3433_v47 = vor.u32 %v3781_v33, %v3432_v31 }
 0xb90   : > { %2269 = vmatpush.bf16.msrb.mxu3 %v3385_v5  ;;  %v3496_v41 = vld [vmem:[%s5001_s0 + $0xb0] sm:$0xf]  ;;  %v3797_v42 = vld [vmem:[%s5001_s0 + $0xb4] sm:$0xf0]  ;;  %v3577_v44 = vor.u32 %v3817_v37, %v3576_v36  ;;  %v3815_v6 = vld [vmem:[%s5001_s0 + $0x144] sm:$0xf0] }
 0xb91   : > { %2675 = vmatpush.bf16.msra.mxu0 %v3449_v15  ;;  %v3833_v43 = vld [vmem:[%s5001_s0 + $0x1d4] sm:$0xf0]  ;;  %v3632_v48 = vld [vmem:[%s5001_s0 + $0x1c0] sm:$0xf]  ;;  %v3831_v51 = vld [vmem:[%s5001_s0 + $0x1c4] sm:$0xf0]  ;;  %v3497_v52 = vor.u32 %v3797_v42, %v3496_v41  ;;  %v3569_v7 = vor.u32 %v3815_v6, %v3568_v46 }
 0xb92   : > { %2688 = vmatpush.bf16.msra.mxu1 %v3513_v18  ;;  %v3641_v45 = vor.u32 %v3833_v43, %v3640_v38  ;;  %v3424_v53 = vld [vmem:[%s5001_s0 + $0x20] sm:$0xf]  ;;  %v3779_v54 = vld [vmem:[%s5001_s0 + $0x24] sm:$0xf0]  ;;  %v3633_v58 = vor.u32 %v3831_v51, %v3632_v48  ;;  %v3560_v59 = vld [vmem:[%s5001_s0 + $0x130] sm:$0xf] }
 0xb93   : > { %2699 = vmatpush.bf16.msra.mxu2 %v3593_v22  ;;  %v3488_v55 = vld [vmem:[%s5001_s0 + $0xa0] sm:$0xf]  ;;  %v3795_v56 = vld [vmem:[%s5001_s0 + $0xa4] sm:$0xf0]  ;;  %v3425_v39 = vor.u32 %v3779_v54, %v3424_v53  ;;  %v3813_v49 = vld [vmem:[%s5001_s0 + $0x134] sm:$0xf0] }
 0xb94   : > { %2712 = vmatpush.bf16.msra.mxu3 %v3657_v23  ;;  %v3624_v60 = vld [vmem:[%s5001_s0 + $0x1b0] sm:$0xf]  ;;  %v3829_v61 = vld [vmem:[%s5001_s0 + $0x1b4] sm:$0xf0]  ;;  %v3489_v8 = vor.u32 %v3795_v56, %v3488_v55  ;;  %v3561_v1 = vor.u32 %v3813_v49, %v3560_v59  ;;  %v3552_v3 = vld [vmem:[%s5001_s0 + $0x120] sm:$0xf] }
 0xb95   : > { %2676 = vmatpush.bf16.msra.mxu0 %v3441_v30  ;;  %v3416_v63 = vld [vmem:[%s5001_s0 + $0x10] sm:$0xf]  ;;  %v3777_v40 = vld [vmem:[%s5001_s0 + $0x14] sm:$0xf0]  ;;  %v3625_v2 = vor.u32 %v3829_v61, %v3624_v60  ;;  %v3616_v5 = vld [vmem:[%s5001_s0 + $0x1a0] sm:$0xf] }
 0xb96   : > { %2689 = vmatpush.bf16.msra.mxu1 %v3505_v35  ;;  %v3480_v50 = vld [vmem:[%s5001_s0 + $0x90] sm:$0xf]  ;;  %v3793_v0 = vld [vmem:[%s5001_s0 + $0x94] sm:$0xf0]  ;;  %v3417_v4 = vor.u32 %v3777_v40, %v3416_v63  ;;  %v3827_v32 = vld [vmem:[%s5001_s0 + $0x1a4] sm:$0xf0] }
 0xb97   : > { %2700 = vmatpush.bf16.msra.mxu2 %v3585_v27  ;;  %v3481_v9 = vor.u32 %v3793_v0, %v3480_v50  ;;  %v3408_v10 = vld [vmem:[%s5001_s0] sm:$0xf]  ;;  %v3775_v11 = vld [vmem:[%s5001_s0 + $0x4] sm:$0xf0]  ;;  %v3788_v14 = vld [vmem:[%s5001_s0 + $0x74] sm:$0xf]  ;;  %v3617_v18 = vor.u32 %v3827_v32, %v3616_v5 }
 0xb98   : > { %2713 = vmatpush.bf16.msra.mxu3 %v3649_v34  ;;  %v3472_v12 = vld [vmem:[%s5001_s0 + $0x80] sm:$0xf]  ;;  %v3791_v13 = vld [vmem:[%s5001_s0 + $0x84] sm:$0xf0]  ;;  %v3466_v15 = vld [vmem:[%s5001_s0 + $0x78] sm:$0xf0]  ;;  %v3409_v19 = vor.u32 %v3775_v11, %v3408_v10 }
 0xb99   : > { %2677 = vmatpush.bf16.msra.mxu0 %v3433_v47  ;;  %v3804_v57 = vld [vmem:[%s5001_s0 + $0xf4] sm:$0xf]  ;;  %v3530_v16 = vld [vmem:[%s5001_s0 + $0xf8] sm:$0xf0]  ;;  %v3473_v20 = vor.u32 %v3791_v13, %v3472_v12  ;;  %v3469_v21 = vor.u32 %v3788_v14, %v3466_v15  ;;  %v3786_v23 = vld [vmem:[%s5001_s0 + $0x64] sm:$0xf] }
 0xb9a   : > { %3404 = vmatmul.msk.bf16.vlgmr.msrb.gmra.mxu2 %vm983_vm1, %v4482_v62  ;;  %2690 = vmatpush.bf16.msra.mxu1 %v3497_v52  ;;  %v3533_v22 = vor.u32 %v3804_v57, %v3530_v16  ;;  %v3458_v24 = vld [vmem:[%s5001_s0 + $0x68] sm:$0xf0]  ;;  %v3802_v25 = vld [vmem:[%s5001_s0 + $0xe4] sm:$0xf]  ;;  %v3784_v29 = vld [vmem:[%s5001_s0 + $0x54] sm:$0xf] }
 0xb9b   : > { %2701 = vmatpush.bf16.msra.mxu2 %v3577_v44  ;;  %3405 = vmatmul.msk.bf16.vlgmr.msrb.gmra.mxu3 %vm983_vm1, %v4482_v62  ;;  %v3811_v62 = vld [vmem:[%s5001_s0 + $0x124] sm:$0xf0]  ;;  %v3522_v26 = vld [vmem:[%s5001_s0 + $0xe8] sm:$0xf0]  ;;  %v3461_v27 = vor.u32 %v3786_v23, %v3458_v24  ;;  %v3450_v30 = vld [vmem:[%s5001_s0 + $0x58] sm:$0xf0] }
 0xb9c   : > { %2714 = vmatpush.bf16.msra.mxu3 %v3641_v45  ;;  %v3553_v17 = vor.u32 %v3811_v62, %v3552_v3  ;;  %v3525_v28 = vor.u32 %v3802_v25, %v3522_v26  ;;  %v3800_v31 = vld [vmem:[%s5001_s0 + $0xd4] sm:$0xf]  ;;  %v3453_v33 = vor.u32 %v3784_v29, %v3450_v30  ;;  %v3514_v34 = vld [vmem:[%s5001_s0 + $0xd8] sm:$0xf0]  ;;  %v3544_v36 = vld [vmem:[%s5001_s0 + $0x110] sm:$0xf] }
 0xb9d   : > { %2678 = vmatpush.bf16.msra.mxu0 %v3425_v39  ;;  %v3517_v35 = vor.u32 %v3800_v31, %v3514_v34  ;;  %v3809_v37 = vld [vmem:[%s5001_s0 + $0x114] sm:$0xf0]  ;;  %v3608_v38 = vld [vmem:[%s5001_s0 + $0x190] sm:$0xf]  ;;  %v3782_v43 = vld [vmem:[%s5001_s0 + $0x44] sm:$0xf] }
 0xb9e   : > { %2691 = vmatpush.bf16.msra.mxu1 %v3489_v8  ;;  %v3545_v41 = vor.u32 %v3809_v37, %v3544_v36  ;;  %v3825_v42 = vld [vmem:[%s5001_s0 + $0x194] sm:$0xf0]  ;;  %v3442_v44 = vld [vmem:[%s5001_s0 + $0x48] sm:$0xf0]  ;;  %v3798_v47 = vld [vmem:[%s5001_s0 + $0xc4] sm:$0xf] }
 0xb9f   : > { %2702 = vmatpush.bf16.msra.mxu2 %v3569_v7  ;;  %v3609_v45 = vor.u32 %v3825_v42, %v3608_v38  ;;  %v3445_v46 = vor.u32 %v3782_v43, %v3442_v44  ;;  %v3506_v6 = vld [vmem:[%s5001_s0 + $0xc8] sm:$0xf0]  ;;  %v3536_v51 = vld [vmem:[%s5001_s0 + $0x100] sm:$0xf]  ;;  %v3807_v52 = vld [vmem:[%s5001_s0 + $0x104] sm:$0xf0] }
 0xba0   : > { %2715 = vmatpush.bf16.msra.mxu3 %v3633_v58  ;;  %v3509_v48 = vor.u32 %v3798_v47, %v3506_v6  ;;  %v3600_v53 = vld [vmem:[%s5001_s0 + $0x180] sm:$0xf]  ;;  %v3537_v54 = vor.u32 %v3807_v52, %v3536_v51  ;;  %v3823_v55 = vld [vmem:[%s5001_s0 + $0x184] sm:$0xf0]  ;;  %v3780_v56 = vld [vmem:[%s5001_s0 + $0x34] sm:$0xf] }
 0xba1   : > { %2679 = vmatpush.bf16.msra.mxu0 %v3417_v4  ;;  %v3434_v7 = vld [vmem:[%s5001_s0 + $0x38] sm:$0xf0]  ;;  %v3601_v58 = vor.u32 %v3823_v55, %v3600_v53  ;;  %v3796_v39 = vld [vmem:[%s5001_s0 + $0xb4] sm:$0xf]  ;;  %v3794_v3 = vld [vmem:[%s5001_s0 + $0xa4] sm:$0xf] }
 0xba2   : > { %2692 = vmatpush.bf16.msra.mxu1 %v3481_v9  ;;  %v3437_v59 = vor.u32 %v3780_v56, %v3434_v7  ;;  %v3498_v49 = vld [vmem:[%s5001_s0 + $0xb8] sm:$0xf0]  ;;  %v3820_v60 = vld [vmem:[%s5001_s0 + $0x174] sm:$0xf]  ;;  %v3490_v62 = vld [vmem:[%s5001_s0 + $0xa8] sm:$0xf0] }
 0xba3   : > { %2703 = vmatpush.bf16.msra.mxu2 %v3561_v1  ;;  %v3501_v61 = vor.u32 %v3796_v39, %v3498_v49  ;;  %v3594_v8 = vld [vmem:[%s5001_s0 + $0x178] sm:$0xf0]  ;;  %v3836_v63 = vld [vmem:[%s5001_s0 + $0x1f4] sm:$0xf]  ;;  %v3778_v1 = vld [vmem:[%s5001_s0 + $0x24] sm:$0xf]  ;;  %v3493_v9 = vor.u32 %v3794_v3, %v3490_v62 }
 0xba4   : > { %2716 = vmatpush.bf16.msra.mxu3 %v3625_v2  ;;  %v3658_v40 = vld [vmem:[%s5001_s0 + $0x1f8] sm:$0xf0]  ;;  %v3597_v50 = vor.u32 %v3820_v60, %v3594_v8  ;;  %v3426_v2 = vld [vmem:[%s5001_s0 + $0x28] sm:$0xf0]  ;;  %v3818_v5 = vld [vmem:[%s5001_s0 + $0x164] sm:$0xf] }
 0xba5   : > { %2680 = vmatpush.bf16.msra.mxu0 %v3409_v19  ;;  %v3661_v0 = vor.u32 %v3836_v63, %v3658_v40  ;;  %v3429_v4 = vor.u32 %v3778_v1, %v3426_v2  ;;  %v3586_v32 = vld [vmem:[%s5001_s0 + $0x168] sm:$0xf0]  ;;  %v3834_v11 = vld [vmem:[%s5001_s0 + $0x1e4] sm:$0xf]  ;;  %v3776_v14 = vld [vmem:[%s5001_s0 + $0x14] sm:$0xf] }
 0xba6   : > { %2693 = vmatpush.bf16.msra.mxu1 %v3473_v20  ;;  %v3589_v10 = vor.u32 %v3818_v5, %v3586_v32  ;;  %v3650_v12 = vld [vmem:[%s5001_s0 + $0x1e8] sm:$0xf0]  ;;  %v3418_v15 = vld [vmem:[%s5001_s0 + $0x18] sm:$0xf0]  ;;  %v3792_v57 = vld [vmem:[%s5001_s0 + $0x94] sm:$0xf] }
 0xba7   : > { %2704 = vmatpush.bf16.msra.mxu2 %v3553_v17  ;;  %v3653_v13 = vor.u32 %v3834_v11, %v3650_v12  ;;  %v3421_v16 = vor.u32 %v3776_v14, %v3418_v15  ;;  %v3482_v17 = vld [vmem:[%s5001_s0 + $0x98] sm:$0xf0]  ;;  %v3774_v25 = vld [vmem:[%s5001_s0 + $0x4] sm:$0xf]  ;;  %v3410_v26 = vld [vmem:[%s5001_s0 + $0x8] sm:$0xf0] }
 0xba8   : > { %2717 = vmatpush.bf16.msra.mxu3 %v3617_v18  ;;  %v3816_v18 = vld [vmem:[%s5001_s0 + $0x154] sm:$0xf]  ;;  %v3578_v19 = vld [vmem:[%s5001_s0 + $0x158] sm:$0xf0]  ;;  %v3485_v20 = vor.u32 %v3792_v57, %v3482_v17  ;;  %v3474_v29 = vld [vmem:[%s5001_s0 + $0x88] sm:$0xf0] }
 0xba9   : > { %2725 = vmatpush.bf16.msrb.mxu0 %v3469_v21  ;;  %v3581_v21 = vor.u32 %v3816_v18, %v3578_v19  ;;  %v3642_v23 = vld [vmem:[%s5001_s0 + $0x1d8] sm:$0xf0]  ;;  %v3814_v30 = vld [vmem:[%s5001_s0 + $0x144] sm:$0xf]  ;;  %v3570_v31 = vld [vmem:[%s5001_s0 + $0x148] sm:$0xf0] }
 0xbaa   : > { %2738 = vmatpush.bf16.msrb.mxu1 %v3533_v22  ;;  %v3832_v22 = vld [vmem:[%s5001_s0 + $0x1d4] sm:$0xf]  ;;  %v3573_v34 = vor.u32 %v3814_v30, %v3570_v31  ;;  %v3634_v36 = vld [vmem:[%s5001_s0 + $0x1c8] sm:$0xf0]  ;;  %v3626_v44 = vld [vmem:[%s5001_s0 + $0x1b8] sm:$0xf0] }
 0xbab   : > { %2705 = vmatpush.bf16.msra.mxu2 %v3545_v41  ;;  %v3645_v24 = vor.u32 %v3832_v22, %v3642_v23  ;;  %v3812_v38 = vld [vmem:[%s5001_s0 + $0x134] sm:$0xf]  ;;  %v3562_v41 = vld [vmem:[%s5001_s0 + $0x138] sm:$0xf0]  ;;  %v3554_v47 = vld [vmem:[%s5001_s0 + $0x128] sm:$0xf0] }
 0xbac   : > { %2718 = vmatpush.bf16.msra.mxu3 %v3609_v45  ;;  %v3828_v42 = vld [vmem:[%s5001_s0 + $0x1b4] sm:$0xf]  ;;  %v3565_v43 = vor.u32 %v3812_v38, %v3562_v41  ;;  %v3826_v6 = vld [vmem:[%s5001_s0 + $0x1a4] sm:$0xf]  ;;  %v3618_v51 = vld [vmem:[%s5001_s0 + $0x1a8] sm:$0xf0] }
 0xbad   : > { %2726 = vmatpush.bf16.msrb.mxu0 %v3461_v27  ;;  %v3790_v27 = vld [vmem:[%s5001_s0 + $0x84] sm:$0xf]  ;;  %v3629_v45 = vor.u32 %v3828_v42, %v3626_v44  ;;  %v3621_v53 = vor.u32 %v3826_v6, %v3618_v51  ;;  %v3546_v55 = vld [vmem:[%s5001_s0 + $0x118] sm:$0xf0]  ;;  %v3824_v56 = vld [vmem:[%s5001_s0 + $0x194] sm:$0xf] }
 0xbae   : > { %2739 = vmatpush.bf16.msrb.mxu1 %v3525_v28  ;;  %v3413_v28 = vor.u32 %v3774_v25, %v3410_v26  ;;  %v3610_v7 = vld [vmem:[%s5001_s0 + $0x198] sm:$0xf0]  ;;  %v3538_v8 = vld [vmem:[%s5001_s0 + $0x108] sm:$0xf0]  ;;  %v3844_v23 = vld [vmem:[%s5003_s21 + $0x30] sm:$0xff] }
 0xbaf   : > { %2706 = vmatpush.bf16.msra.mxu2 %v3537_v54  ;;  %v3808_v54 = vld [vmem:[%s5001_s0 + $0x114] sm:$0xf]  ;;  %v3613_v49 = vor.u32 %v3824_v56, %v3610_v7  ;;  %v3845_v22 = vld [vmem:[%s5003_s21 + $0x38] sm:$0xff]  ;;  %v3842_v25 = vld [vmem:[%s5003_s21 + $0x20] sm:$0xff] }
 0xbb0   : > { %2719 = vmatpush.bf16.msra.mxu3 %v3601_v58  ;;  %v3549_v39 = vor.u32 %v3808_v54, %v3546_v55  ;;  %v3841_v26 = vld [vmem:[%s5003_s21 + $0x18] sm:$0xff]  ;;  %v3839_v30 = vld [vmem:[%s5003_s21 + $0x8] sm:$0xff]  ;;  %v3848_v38 = vld [vmem:[%s5003_s21 + $0x50] sm:$0xff] }
 0xbb1   : > { %2727 = vmatpush.bf16.msrb.mxu0 %v3453_v33  ;;  %v3477_v33 = vor.u32 %v3790_v27, %v3474_v29  ;;  %v3853_v27 = vld [vmem:[%s5003_s21 + $0x78] sm:$0xff]  ;;  %v3852_v29 = vld [vmem:[%s5003_s21 + $0x70] sm:$0xff]  ;;  %v3851_v31 = vld [vmem:[%s5003_s21 + $0x68] sm:$0xff] }
 0xbb2   : > { %2740 = vmatpush.bf16.msrb.mxu1 %v3517_v35  ;;  %v3830_v35 = vld [vmem:[%s5001_s0 + $0x1c4] sm:$0xf]  ;;  %v3847_v41 = vld [vmem:[%s5003_s21 + $0x48] sm:$0xff]  ;;  %v2343_v44 = vld [vmem:[%s5004_s25] sm:$0x3] }
 0xbb3   : > { %2751 = vmatpush.bf16.msrb.mxu2 %v3597_v50  ;;  %v3637_v37 = vor.u32 %v3830_v35, %v3634_v36  ;;  %v3822_v50 = vld [vmem:[%s5001_s0 + $0x184] sm:$0xf]  ;;  %v3849_v35 = vld [vmem:[%s5003_s21 + $0x58] sm:$0xff] }
 0xbb4   : > { %2764 = vmatpush.bf16.msrb.mxu3 %v3661_v0  ;;  %v3602_v0 = vld [vmem:[%s5001_s0 + $0x188] sm:$0xf0] }
 0xbb5   : > { %2728 = vmatpush.bf16.msrb.mxu0 %v3445_v46  ;;  %v3810_v46 = vld [vmem:[%s5001_s0 + $0x124] sm:$0xf]  ;;  %v3605_v62 = vor.u32 %v3822_v50, %v3602_v0 }
 0xbb6   : > { %2741 = vmatpush.bf16.msrb.mxu1 %v3509_v48  ;;  %v2160_v48 = vld [vmem:[%s5002_s17] sm:$0xf]  ;;  %v3557_v52 = vor.u32 %v3810_v46, %v3554_v47  ;;  %v2349_v46 = vperm.slane %v2343_v44, 0 }
 0xbb7   : > { %2752 = vmatpush.bf16.msrb.mxu2 %v3589_v10  ;;  %v2164_v58 = vperm.slane %v2160_v48, 0  ;;  %v2166_v11 = vperm.slane %v2160_v48, 2  ;;  %v2167_v12 = vperm.slane %v2160_v48, 3 }
 0xbb8   : > { %2765 = vmatpush.bf16.msrb.mxu3 %v3653_v13 }
 0xbb9   : > { %2729 = vmatpush.bf16.msrb.mxu0 %v3437_v59  ;;  %v2165_v59 = vperm.slane %v2160_v48, 1 }
 0xbba   : > { %2742 = vmatpush.bf16.msrb.mxu1 %v3501_v61  ;;  %v3806_v61 = vld [vmem:[%s5001_s0 + $0x104] sm:$0xf] }
 0xbbb   : > { %2753 = vmatpush.bf16.msrb.mxu2 %v3581_v21  ;;  %v3541_v3 = vor.u32 %v3806_v61, %v3538_v8 }
 0xbbc   : > { %2766 = vmatpush.bf16.msrb.mxu3 %v3645_v24  ;;  %v3843_v24 = vld [vmem:[%s5003_s21 + $0x28] sm:$0xff] }
 0xbbd   : > { %2730 = vmatpush.bf16.msrb.mxu0 %v3429_v4 }
 0xbbe   : > { %2743 = vmatpush.bf16.msrb.mxu1 %v3493_v9 }
 0xbbf   : > { %2754 = vmatpush.bf16.msrb.mxu2 %v3573_v34  ;;  %v3850_v34 = vld [vmem:[%s5003_s21 + $0x60] sm:$0xff] }
 0xbc0   : > { %2767 = vmatpush.bf16.msrb.mxu3 %v3637_v37 }
 0xbc1   : > { %2731 = vmatpush.bf16.msrb.mxu0 %v3421_v16 }
 0xbc2   : > { %2744 = vmatpush.bf16.msrb.mxu1 %v3485_v20 }
 0xbc3   : > { %2755 = vmatpush.bf16.msrb.mxu2 %v3565_v43 }
 0xbc4   : > { %2768 = vmatpush.bf16.msrb.mxu3 %v3629_v45  ;;  %v3846_v45 = vld [vmem:[%s5003_s21 + $0x40] sm:$0xff] }
 0xbc5   : > { %2732 = vmatpush.bf16.msrb.mxu0 %v3413_v28  ;;  %v3840_v28 = vld [vmem:[%s5003_s21 + $0x10] sm:$0xff] }
 0xbc6   : > { %2745 = vmatpush.bf16.msrb.mxu1 %v3477_v33  ;;  %v3838_v33 = vld [vmem:[%s5003_s21] sm:$0xff] }
 0xbc7   : > { %2756 = vmatpush.bf16.msrb.mxu2 %v3557_v52 }
 0xbc8   : > { %2769 = vmatpush.bf16.msrb.mxu3 %v3621_v53 }
 0xbcb   : > { %2757 = vmatpush.bf16.msrb.mxu2 %v3549_v39 }
 0xbcc   : > { %2770 = vmatpush.bf16.msrb.mxu3 %v3613_v49 }
 0xbcf   : > { %2758 = vmatpush.bf16.msrb.mxu2 %v3541_v3 }
 0xbd0   : > { %2771 = vmatpush.bf16.msrb.mxu3 %v3605_v62 }
 0xc0d   : > { %v2232_v60 = vpop.f32.mrf.mxu2 }
 0xc0e   : > { %v2233_v63 = vadd.f32 %v2232_v60, %v2164_v58  ;;  %v2245_v40 = vpop.f32.mrf.mxu3 }
 0xc0f   : > { %v2246_v1 = vadd.f32 %v2245_v40, %v2165_v59  ;;  %v2350_v59 = vperm.slane %v2343_v44, 1 }
 0xc10   : > { %v2275_v2 = vmax.f32 %v2233_v63, 0.0 }
 0xc11   : > { %v2276_v4 = vmax.f32 %v2246_v1, 0.0 }
 0xc12   : > { %v2344_v5 = vpack.c.bf16 %v2275_v2, %v2275_v2 }
 0xc13   : > { %v2345_v32 = vpack.c.bf16 %v2276_v4, %v2276_v4 }
 0xc14   : > { %2681 = vmatmul.bf16.vlgmr.msra.gmra.mxu0 %v2344_v5 }
 0xc15   : > { %2694 = vmatmul.bf16.vlgmr.msra.gmra.mxu1 %v2345_v32  ;;  %v2234_v9 = vpop.f32.mrf.mxu2  ;;  %2913 = vmatpush.bf16.msra.mxu0 %v3845_v22 }
 0xc16   : > { %v2247_v10 = vpop.f32.mrf.mxu3  ;;  %2926 = vmatpush.bf16.msra.mxu1 %v3853_v27 }
 0xc19   : > { %2914 = vmatpush.bf16.msra.mxu0 %v3844_v23 }
 0xc1a   : > { %2927 = vmatpush.bf16.msra.mxu1 %v3852_v29 }
 0xc1d   : > { %v2258_v13 = vpop.f32.mrf.mxu2  ;;  %2915 = vmatpush.bf16.msra.mxu0 %v3843_v24 }
 0xc1e   : > { %v2259_v14 = vadd.f32 %v2258_v13, %v2166_v11  ;;  %v2271_v15 = vpop.f32.mrf.mxu3  ;;  %2928 = vmatpush.bf16.msra.mxu1 %v3851_v31 }
 0xc1f   : > { %v2272_v57 = vadd.f32 %v2271_v15, %v2167_v12 }
 0xc20   : > { %v2277_v16 = vmax.f32 %v2259_v14, 0.0 }
 0xc21   : > { %v2278_v17 = vmax.f32 %v2272_v57, 0.0  ;;  %2916 = vmatpush.bf16.msra.mxu0 %v3842_v25 }
 0xc22   : > { %v2346_v18 = vpack.c.bf16 %v2277_v16, %v2277_v16  ;;  %2929 = vmatpush.bf16.msra.mxu1 %v3850_v34 }
 0xc23   : > { %v2347_v19 = vpack.c.bf16 %v2278_v17, %v2278_v17 }
 0xc24   : > { %2707 = vmatmul.bf16.vlgmr.msra.gmra.mxu2 %v2346_v18  ;;  %2733 = vmatmul.bf16.vlgmr.msrb.gmra.mxu0 %v2344_v5 }
 0xc25   : > { %2720 = vmatmul.bf16.vlgmr.msra.gmra.mxu3 %v2347_v19  ;;  %2746 = vmatmul.bf16.vlgmr.msrb.gmra.mxu1 %v2345_v32  ;;  %v2260_v20 = vpop.f32.mrf.mxu2  ;;  %v3932_v32 = vld [vmem:[%s5005_s27] ss:$0 sm:$0xff] }
 0xc26   : > { %v2273_v21 = vpop.f32.mrf.mxu3  ;;  %2917 = vmatpush.bf16.msra.mxu0 %v3841_v26  ;;  %2930 = vmatpush.bf16.msra.mxu1 %v3849_v35 }
 0xc2a   : > { %2918 = vmatpush.bf16.msra.mxu0 %v3840_v28  ;;  %2931 = vmatpush.bf16.msra.mxu1 %v3848_v38 }
 0xc2e   : > { %2919 = vmatpush.bf16.msra.mxu0 %v3839_v30  ;;  %2932 = vmatpush.bf16.msra.mxu1 %v3847_v41 }
 0xc32   : > { %2920 = vmatpush.bf16.msra.mxu0 %v3838_v33  ;;  %2933 = vmatpush.bf16.msra.mxu1 %v3846_v45 }
 0xc34   : > { %2759 = vmatmul.bf16.vlgmr.msrb.gmra.mxu2 %v2346_v18 }
 0xc35   : > { %2772 = vmatmul.bf16.vlgmr.msrb.gmra.mxu3 %v2347_v19 }
 0xc91   : > { %v2682_v36 = vpop.f32.mrf.mxu0 }
 0xc92   : > { %v2695_v37 = vpop.f32.mrf.mxu1  ;;  %v2683_v6 = vadd.f32 %v2682_v36, %v2349_v46 }
 0xc94   : > { %v2696_v51 = vadd.f32 %v2695_v37, %v2683_v6 }
 0xc99   : > { %v2684_v42 = vpop.f32.mrf.mxu0 }
 0xc9a   : > { %v2697_v43 = vpop.f32.mrf.mxu1 }
 0xca1   : > { %v2734_v47 = vpop.f32.mrf.mxu0 }
 0xca2   : > { %v2747_v48 = vpop.f32.mrf.mxu1  ;;  %v2735_v61 = vadd.f32 %v2734_v47, %v2350_v59 }
 0xca4   : > { %v2748_v8 = vadd.f32 %v2747_v48, %v2735_v61 }
 0xca7   : > { %v2708_v52 = vpop.f32.mrf.mxu2 }
 0xca8   : > { %v2709_v53 = vadd.f32 %v2708_v52, %v2696_v51  ;;  %v2721_v54 = vpop.f32.mrf.mxu3 }
 0xca9   : > { %v2736_v55 = vpop.f32.mrf.mxu0 }
 0xcaa   : > { %v2722_v56 = vadd.f32 %v2721_v54, %v2709_v53  ;;  %v2749_v7 = vpop.f32.mrf.mxu1 }
 0xcac   : > { %v2777_v58 = vmax.f32 %v2722_v56, 0.0 }
 0xcae   : > { %v2812_v39 = vpack.c.bf16 %v2777_v58, %v2777_v58 }
 0xcaf   : > { %v2710_v49 = vpop.f32.mrf.mxu2 }
 0xcb0   : > { %v2723_v60 = vpop.f32.mrf.mxu3  ;;  %2921 = vmatmul.bf16.vlgmr.msra.gmra.mxu0 %v2812_v39 }
 0xcb7   : > { %v2760_v63 = vpop.f32.mrf.mxu2 }
 0xcb8   : > { %v2761_v40 = vadd.f32 %v2760_v63, %v2748_v8  ;;  %v2773_v50 = vpop.f32.mrf.mxu3 }
 0xcba   : > { %v2774_v0 = vadd.f32 %v2773_v50, %v2761_v40 }
 0xcbc   : > { %v2778_v1 = vmax.f32 %v2774_v0, 0.0 }
 0xcbe   : > { %v2813_v2 = vpack.c.bf16 %v2778_v1, %v2778_v1 }
 0xcbf   : > { %v2762_v3 = vpop.f32.mrf.mxu2 }
 0xcc0   : > { %v2775_v4 = vpop.f32.mrf.mxu3  ;;  %2934 = vmatmul.bf16.vlgmr.msra.gmra.mxu1 %v2813_v2 }
 0xd2d   : > { %v2922_v62 = vpop.f32.mrf.mxu0 }
 0xd2e   : > { %v2923_v9 = vadd.f32 %v3932_v32, %v2922_v62 }
 0xd35   : > { %v2924_v5 = vpop.f32.mrf.mxu0 }
 0xd3d   : > { %v2935_v10 = vpop.f32.mrf.mxu1 }
 0xd3e   : > { %v2936_v11 = vadd.f32 %v2935_v10, %v2923_v9 }
 0xd40   : > { %2939 = vst [vmem:[#allocation3] sm:$0x3] %v2936_v11 }
 0xd45   : > { %v2937_v12 = vpop.f32.mrf.mxu1 }
 0xd46 PF: > { %p3858_p6 = scmp.eq.s32.totalorder %s4102_s30, 1  ;;  %s3975_s28 = smov [#allocation3]  }
 0xd47   : > { %s2946_s3 = sshll.u32 %s3975_s28, 4  ;;  %s5006_s2 = sld [smem:[#allocation25_spill]]  ;;  %s2947_s3 = int_to_ptr.vmem [resolvable:$true] %s2946_s3 }
 0xd4d   : > { %s2948_s18 = sshll.u32 %s5006_s2, 4  ;;  %s2949_s18 = int_to_ptr.hbm [resolvable:$true] %s2948_s18 }
 0xd4e   : > { %3855 = dma.vmem_to_hbm [thread:$0]  (%p3858_p6), %s2947_s3, 32, %s2949_s18, [#allocation4]  }
 0xd4f   : > { %3966 = dma.done.wait (%p3858_p6), [#allocation4], 32  }
 0xd50   : > { %3968 = vsyncadd (%p3858_p6), [#allocation4], 4294967264 }
 0xd51 PF: > { %s5007_s22 = sld [smem:[#allocation6_spill]] }
 0xd57   : > { %s34_s4 = sadd.s32 1, %s5007_s22  }
 0xd58   : > { %p31_p7 = scmp.ge.s32.totalorder %s34_s4, 4  }
 0xd5a   :  { %33 = sbr.rel (!%p31_p7) target bundleno = 17 (0x11), region = 213 }
 0xd5f   :  { %2962 = vsyncpa [#allocation4], 1 }
 0xd60   :  { %2964 = vsyncpa [#allocation4 + $0x1], 1 }

</bundles_post_ra>
